<compile_context>
chip_gen: v7x
topology: tpu7x:2x2x1
jax: 0.10.0
libtpu: 0.0.40
codegen_flags: <defaults>
</compile_context>

<pallas_src>
import jax
import jax.numpy as jnp
import numpy as np
from jax.experimental import pallas as pl
from jax.experimental.pallas import tpu as pltpu


_W4_OFF = 7 * 128     # row offset of the (padded) numerical-input weight in wpack
_BATCH_ALIGN = 16     # bf16 sublane packing -> batch blocks are multiples of 16
_MAX_TB = 512         # per-block row cap (VMEM stays ~3 MiB incl. double buffering)


def _round_up(x, m):
    return -(-x // m) * m


# ----------------------------------------------------------------------------
# Kernel: 9 bf16 matmuls (f32 accumulate) + bias/ReLU chain + VPU/XLU head.
# ----------------------------------------------------------------------------
def _make_kernel(f_pad):
    def kernel(xt_ref, xn_ref, w1_ref, w2_ref, wp_ref, bp_ref, out_ref):
        def bias(r, width=128):
            # [1, width] f32 slice of the packed bias slab (static, aligned).
            return bp_ref[pl.ds(r, 1), pl.ds(0, width)]

        def wblk(i):
            # [128, 128] bf16 block of the packed weight slab (128-row aligned).
            return wp_ref[pl.ds(i * 128, 128), :]

        def dense(x, w, b, relu=True):
            y = jnp.dot(x.astype(jnp.bfloat16), w,
                        preferred_element_type=jnp.float32) + b
            return jnp.maximum(y, 0.0) if relu else y

        # text branch: 768 -> 256 -> 128 -> 64 (padded to 128 lanes)
        t = dense(xt_ref[...], w1_ref[...], bias(0, 256))        # [B, 256]
        t = dense(t, w2_ref[...], bias(1))                        # [B, 128]
        t = dense(t, wblk(0), bias(2))                            # [B, 128], cols 64.. = 0

        # numerical branch: F -> 32 -> 64 -> 32 (all padded to 128 lanes)
        n = dense(xn_ref[...], wp_ref[pl.ds(_W4_OFF, f_pad), :], bias(3))
        n = dense(n, wblk(1), bias(4))
        n = dense(n, wblk(2), bias(5))                            # [B, 128], cols 32.. = 0

        # feature_fusion: concat([t, n]) @ W7 expressed as a split matmul
        f = (jnp.dot(t.astype(jnp.bfloat16), wblk(3),
                     preferred_element_type=jnp.float32)
             + jnp.dot(n.astype(jnp.bfloat16), wblk(4),
                       preferred_element_type=jnp.float32)
             + bias(6))
        f = jnp.maximum(f, 0.0)                                   # [B, 128]
        # combined dim (96) != fused dim (128) -> residual add never executes.

        # classifier: 128 -> 64 -> 32 -> 1
        h = dense(f, wblk(5), bias(7))
        h = dense(h, wblk(6), bias(8))                            # [B, 128], cols 32.. = 0
        # final 32->1 as VPU mul + XLU lane-reduce (no degenerate N=1 MXU op);
        # w10 row and b10 live (in f32) in the bias slab.
        w10row = bp_ref[pl.ds(9, 1), pl.ds(0, 128)]               # [1, 128], lanes 32.. = 0
        b10 = bp_ref[pl.ds(10, 1), pl.ds(0, 1)]                   # [1, 1]
        out_ref[...] = jnp.sum(h * w10row, axis=-1, keepdims=True) + b10

    return kernel


# ----------------------------------------------------------------------------
# Wrapper: batch grid ("parallel" -> v7x megacore), weights VMEM-resident.
# ----------------------------------------------------------------------------
def run_kernel(cls_emb, num_feats, packed):
    w1, w2, wpack, bpack, f_pad = packed
    B, H = cls_emb.shape
    F = num_feats.shape[1]

    # Pad numerical feature dim to match the zero-padded rows of w4 in wpack.
    if F < f_pad:
        num_feats = jnp.pad(num_feats, ((0, 0), (0, f_pad - F)))

    # Batch blocking:
    #  * round B up to a multiple of 16 (bf16 sublane packing),
    #  * whenever possible use >= 2 blocks so dimension_semantics=("parallel",)
    #    can actually split work across v7x's two TensorCores,
    #  * cap blocks at 512 rows (amortizes per-step overhead on v5e/v6e while
    #    keeping per-block VMEM ~3 MiB and still giving >= 2 steps for large B).
    Bp = _round_up(max(B, _BATCH_ALIGN), _BATCH_ALIGN)
    if Bp < 2 * _BATCH_ALIGN:
        tb = Bp                                           # too small to split
    else:
        tb = min(_MAX_TB, _round_up(Bp // 2, _BATCH_ALIGN))
        Bp = _round_up(Bp, tb)
    if Bp != B:
        pad = Bp - B
        cls_emb = jnp.pad(cls_emb, ((0, pad), (0, 0)))
        num_feats = jnp.pad(num_feats, ((0, pad), (0, 0)))

    # Matmul inputs are bf16 anyway -> halve the activation DMA for both streams.
    xt = cls_emb.astype(jnp.bfloat16)
    xn = num_feats.astype(jnp.bfloat16)

    flops = int(2 * Bp * (768 * 256 + 256 * 128 + 128 * 64 + f_pad * 32 + 32 * 64
                          + 64 * 32 + 96 * 128 + 128 * 64 + 64 * 32 + 32))
    bytes_accessed = int(xt.size * 2 + xn.size * 2 + w1.size * 2 + w2.size * 2
                         + wpack.size * 2 + bpack.size * 4 + Bp * 4)

    out = pl.pallas_call(
        _make_kernel(f_pad),
        out_shape=jax.ShapeDtypeStruct((Bp, 1), jnp.float32),
        grid_spec=pltpu.PrefetchScalarGridSpec(
            num_scalar_prefetch=0,
            grid=(Bp // tb,),
            in_specs=[
                pl.BlockSpec((tb, H), lambda i: (i, 0)),        # CLS embedding block
                pl.BlockSpec((tb, f_pad), lambda i: (i, 0)),    # numerical block
                # Constant index_maps -> weights stay VMEM-resident across
                # batch blocks (their default double buffering costs ~0.7 MiB,
                # comfortably inside the limit below).
                pl.BlockSpec(w1.shape, lambda i: (0, 0)),
                pl.BlockSpec(w2.shape, lambda i: (0, 0)),
                pl.BlockSpec(wpack.shape, lambda i: (0, 0)),
                pl.BlockSpec(bpack.shape, lambda i: (0, 0)),
            ],
            out_specs=pl.BlockSpec((tb, 1), lambda i: (i, 0)),
        ),
        compiler_params=pltpu.CompilerParams(
            dimension_semantics=("parallel",),      # batch split across 2 TCs on v7x
            vmem_limit_bytes=32 * 1024 * 1024,      # tb=512 blocks + resident weights
        ),
        cost_estimate=pl.CostEstimate(flops=flops, transcendentals=0,
                                      bytes_accessed=bytes_accessed),
    )(xt, xn, w1, w2, wpack, bpack)
    return out[:B]


# ----------------------------------------------------------------------------
# Deterministic parameter construction + exact eval-mode BN folding (glue).
# ----------------------------------------------------------------------------
def _init_linear(key, fan_in, fan_out):
    kw, kb = jax.random.split(key)
    w = jax.random.normal(kw, (fan_in, fan_out), jnp.float32) / np.sqrt(fan_in)
    b = jax.random.normal(kb, (1, fan_out), jnp.float32) * 0.01
    return w, b


def _init_bn(key, dim):
    kg, kb, km, kv = jax.random.split(key, 4)
    gamma = 1.0 + 0.1 * jax.random.normal(kg, (dim,), jnp.float32)
    beta = 0.05 * jax.random.normal(kb, (dim,), jnp.float32)
    mean = 0.05 * jax.random.normal(km, (dim,), jnp.float32)
    var = jax.random.uniform(kv, (dim,), jnp.float32, 0.5, 1.5)
    return gamma, beta, mean, var


def _fold_bn(w, b, bn, eps=1e-5):
    gamma, beta, mean, var = bn
    scale = gamma / jnp.sqrt(var + eps)
    return w * scale[None, :], (b - mean[None, :]) * scale[None, :] + beta[None, :]


def make_params(num_numerical_features, hidden=768, seed=0):
    keys = jax.random.split(jax.random.PRNGKey(seed), 32)
    ki = iter(range(32))
    lin = lambda fi, fo: _init_linear(keys[next(ki)], fi, fo)
    bn = lambda d: _init_bn(keys[next(ki)], d)

    w1, b1 = _fold_bn(*lin(hidden, 256), bn(256))
    w2, b2 = _fold_bn(*lin(256, 128), bn(128))
    w3, b3 = _fold_bn(*lin(128, 64), bn(64))
    w4, b4 = _fold_bn(*lin(num_numerical_features, 32), bn(32))
    w5, b5 = _fold_bn(*lin(32, 64), bn(64))
    w6, b6 = _fold_bn(*lin(64, 32), bn(32))
    w7, b7 = _fold_bn(*lin(96, 128), bn(128))
    w8, b8 = _fold_bn(*lin(128, 64), bn(64))
    w9, b9 = _fold_bn(*lin(64, 32), bn(32))
    w10, b10 = lin(32, 1)
    return [w1, b1, w2, b2, w3, b3, w4, b4, w5, b5, w6, b6,
            w7, b7, w8, b8, w9, b9, w10, b10]


def pack_params(p, num_numerical_features):
    (w1, b1, w2, b2, w3, b3, w4, b4, w5, b5, w6, b6,
     w7, b7, w8, b8, w9, b9, w10, b10) = p
    # Multiple of 16 (bf16 sublane packing) so the w4 slice of the bf16 slab
    # is tile-aligned.
    f_pad = max(16, _round_up(num_numerical_features, 16))

    def pad_block(w, rows=128, cols=128):
        out = jnp.zeros((rows, cols), jnp.float32)
        return out.at[:w.shape[0], :w.shape[1]].set(w)

    # Packed weight slab (bf16): zero-padding is exact (zeros propagate through
    # ReLU and are multiplied by zero rows in the next layer).
    wpack = jnp.concatenate([
        pad_block(w3),              # blk 0
        pad_block(w5),              # blk 1
        pad_block(w6),              # blk 2
        pad_block(w7[:64, :]),      # blk 3: W7 rows for text features
        pad_block(w7[64:, :]),      # blk 4: W7 rows for numerical features
        pad_block(w8),              # blk 5
        pad_block(w9),              # blk 6
        pad_block(w4, rows=f_pad),  # numerical input layer (rows = f_pad)
    ], axis=0).astype(jnp.bfloat16)

    # Packed bias / head slab (f32): row r, lanes [0:width).
    bpack = jnp.zeros((16, 256), jnp.float32)

    def setrow(bp, r, vec):
        v = vec.reshape(-1)
        return bp.at[r, :v.shape[0]].set(v)

    for r, vec in enumerate([b1, b2, b3, b4, b5, b6, b7, b8, b9]):
        bpack = setrow(bpack, r, vec)
    bpack = setrow(bpack, 9, w10[:, 0])      # final projection row (kept f32)
    bpack = bpack.at[10, 0].set(b10[0, 0])   # final bias

    return (w1.astype(jnp.bfloat16), w2.astype(jnp.bfloat16), wpack, bpack, f_pad)


# ----------------------------------------------------------------------------
# Pure-JAX reference.  matmul_dtype=bf16 mirrors the kernel numerics exactly;
# matmul_dtype=f32 reproduces the original fp32 PyTorch eval-mode forward.
# ----------------------------------------------------------------------------
def ref_forward(cls_emb, num_feats, p, matmul_dtype=jnp.bfloat16):
    (w1, b1, w2, b2, w3, b3, w4, b4, w5, b5, w6, b6,
     w7, b7, w8, b8, w9, b9, w10, b10) = p

    def dense(x, w, b, relu=True):
        y = jnp.dot(x.astype(matmul_dtype), w.astype(matmul_dtype),
                    preferred_element_type=jnp.float32,
                    precision=jax.lax.Precision.HIGHEST) + b
        return jnp.maximum(y, 0.0) if relu else y

    t = dense(cls_emb, w1, b1)
    t = dense(t, w2, b2)
    t = dense(t, w3, b3)
    n = dense(num_feats, w4, b4)
    n = dense(n, w5, b5)
    n = dense(n, w6, b6)
    combined = jnp.concatenate([t, n], axis=1)          # [B, 96]
    fused = dense(combined, w7, b7)                     # [B, 128]
    # 96 != 128 -> no residual add (matches the PyTorch branch)
    h = dense(fused, w8, b8)
    h = dense(h, w9, b9)
    return h @ w10 + b10                                # final layer in f32


if __name__ == "__main__":
    B = 32            # small batch; with tb=16 the grid has 2 steps -> megacore split
    HIDDEN = 768      # PubMedBERT hidden size (transformer_output_dim)
    NUM_FEATS = 16    # num_numerical_features

    key = jax.random.PRNGKey(0)
    k1, k2 = jax.random.split(key)
    # TODO(synk): tokenizer + pretrained PubMedBERT encoder are not re-implemented;
    # the CLS embedding (last_hidden_state[:, 0, :]) is synthesized as the kernel's
    # text-branch input.
    cls_emb = jax.random.normal(k1, (B, HIDDEN), jnp.float32)
    num_feats = jax.random.normal(k2, (B, NUM_FEATS), jnp.float32)

    logical = make_params(NUM_FEATS, hidden=HIDDEN, seed=0)
    packed = pack_params(logical, NUM_FEATS)

    logits = jax.block_until_ready(run_kernel(cls_emb, num_feats, packed))

    # 1) Tight check against a reference mirroring the kernel numerics (bf16 MXU).
    exp_bf16 = ref_forward(cls_emb, num_feats, logical, matmul_dtype=jnp.bfloat16)
    np.testing.assert_allclose(np.asarray(logits), np.asarray(exp_bf16),
                               rtol=1e-2, atol=1e-3)
    # 2) Loose check against the full-fp32 path (original PyTorch eval numerics).
    exp_f32 = ref_forward(cls_emb, num_feats, logical, matmul_dtype=jnp.float32)
    np.testing.assert_allclose(np.asarray(logits), np.asarray(exp_f32),
                               rtol=0.1, atol=0.1)

    assert logits.shape == (B, 1) and logits.dtype == jnp.float32
    print("KERNEL_OK")
</pallas_src>

<mosaic_0001>
module attributes {stable_mosaic.version = 11 : i64} {
  func.func @kernel(%arg0: i32, %arg1: memref<16x768xbf16, #tpu.memory_space<vmem>>, %arg2: memref<16x16xbf16, #tpu.memory_space<vmem>>, %arg3: memref<768x256xbf16, #tpu.memory_space<vmem>>, %arg4: memref<256x128xbf16, #tpu.memory_space<vmem>>, %arg5: memref<912x128xbf16, #tpu.memory_space<vmem>>, %arg6: memref<16x256xf32, #tpu.memory_space<vmem>>, %arg7: memref<16x1xf32, #tpu.memory_space<vmem>>) attributes {dimension_semantics = [#tpu.dimension_semantics<parallel>], iteration_bounds = array<i64: 2>, scalar_prefetch = 0 : i64, scratch_operands = 0 : i64, tpu.core_type = #tpu.core_type<tc>, window_params = [{transform_indices = @transform_0, window_bounds = array<i64: 16, 768>}, {transform_indices = @transform_1, window_bounds = array<i64: 16, 16>}, {pipeline_mode = #tpu.pipeline_mode<synchronous>, transform_indices = @transform_2, window_bounds = array<i64: 768, 256>}, {pipeline_mode = #tpu.pipeline_mode<synchronous>, transform_indices = @transform_3, window_bounds = array<i64: 256, 128>}, {pipeline_mode = #tpu.pipeline_mode<synchronous>, transform_indices = @transform_4, window_bounds = array<i64: 912, 128>}, {pipeline_mode = #tpu.pipeline_mode<synchronous>, transform_indices = @transform_5, window_bounds = array<i64: 16, 256>}, {transform_indices = @transform_6, window_bounds = array<i64: 16, 1>}]} {
    %c0 = arith.constant 0 : index
    %c0_0 = arith.constant 0 : index
    %0 = vector.load %arg1[%c0, %c0_0] : memref<16x768xbf16, #tpu.memory_space<vmem>>, vector<16x768xbf16>
    %c0_1 = arith.constant 0 : index
    %c0_2 = arith.constant 0 : index
    %1 = vector.load %arg3[%c0_1, %c0_2] : memref<768x256xbf16, #tpu.memory_space<vmem>>, vector<768x256xbf16>
    %c0_3 = arith.constant 0 : index
    %c0_4 = arith.constant 0 : index
    %2 = vector.load %arg6[%c0_3, %c0_4] : memref<16x256xf32, #tpu.memory_space<vmem>>, vector<1x256xf32>
    %cst = arith.constant dense<0.000000e+00> : vector<16x256xf32>
    %3 = tpu.matmul %0, %1, %cst {dimension_numbers = #tpu.dot_dimension_numbers<[1], [0], [0], [1], [0, 0, 1, 1], [], []>} : vector<16x768xbf16>, vector<768x256xbf16>, vector<16x256xf32> -> vector<16x256xf32>
    %4 = vector.broadcast %2 : vector<1x256xf32> to vector<16x256xf32>
    %5 = arith.addf %3, %4 : vector<16x256xf32>
    %cst_5 = arith.constant 0.000000e+00 : f32
    %6 = vector.broadcast %cst_5 : f32 to vector<16x256xf32>
    %7 = arith.maximumf %5, %6 : vector<16x256xf32>
    %c0_6 = arith.constant 0 : index
    %c0_7 = arith.constant 0 : index
    %8 = vector.load %arg4[%c0_6, %c0_7] : memref<256x128xbf16, #tpu.memory_space<vmem>>, vector<256x128xbf16>
    %c1 = arith.constant 1 : index
    %c0_8 = arith.constant 0 : index
    %9 = vector.load %arg6[%c1, %c0_8] : memref<16x256xf32, #tpu.memory_space<vmem>>, vector<1x128xf32>
    %10 = arith.truncf %7 : vector<16x256xf32> to vector<16x256xbf16>
    %cst_9 = arith.constant dense<0.000000e+00> : vector<16x128xf32>
    %11 = tpu.matmul %10, %8, %cst_9 {dimension_numbers = #tpu.dot_dimension_numbers<[1], [0], [0], [1], [0, 0, 1, 1], [], []>} : vector<16x256xbf16>, vector<256x128xbf16>, vector<16x128xf32> -> vector<16x128xf32>
    %12 = vector.broadcast %9 : vector<1x128xf32> to vector<16x128xf32>
    %13 = arith.addf %11, %12 : vector<16x128xf32>
    %cst_10 = arith.constant 0.000000e+00 : f32
    %14 = vector.broadcast %cst_10 : f32 to vector<16x128xf32>
    %15 = arith.maximumf %13, %14 : vector<16x128xf32>
    %c0_11 = arith.constant 0 : index
    %c0_12 = arith.constant 0 : index
    %16 = vector.load %arg5[%c0_11, %c0_12] : memref<912x128xbf16, #tpu.memory_space<vmem>>, vector<128x128xbf16>
    %c2 = arith.constant 2 : index
    %c0_13 = arith.constant 0 : index
    %17 = vector.load %arg6[%c2, %c0_13] : memref<16x256xf32, #tpu.memory_space<vmem>>, vector<1x128xf32>
    %18 = arith.truncf %15 : vector<16x128xf32> to vector<16x128xbf16>
    %cst_14 = arith.constant dense<0.000000e+00> : vector<16x128xf32>
    %19 = tpu.matmul %18, %16, %cst_14 {dimension_numbers = #tpu.dot_dimension_numbers<[1], [0], [0], [1], [0, 0, 1, 1], [], []>} : vector<16x128xbf16>, vector<128x128xbf16>, vector<16x128xf32> -> vector<16x128xf32>
    %20 = vector.broadcast %17 : vector<1x128xf32> to vector<16x128xf32>
    %21 = arith.addf %19, %20 : vector<16x128xf32>
    %cst_15 = arith.constant 0.000000e+00 : f32
    %22 = vector.broadcast %cst_15 : f32 to vector<16x128xf32>
    %23 = arith.maximumf %21, %22 : vector<16x128xf32>
    %c0_16 = arith.constant 0 : index
    %c0_17 = arith.constant 0 : index
    %24 = vector.load %arg2[%c0_16, %c0_17] : memref<16x16xbf16, #tpu.memory_space<vmem>>, vector<16x16xbf16>
    %c896 = arith.constant 896 : index
    %c0_18 = arith.constant 0 : index
    %25 = vector.load %arg5[%c896, %c0_18] : memref<912x128xbf16, #tpu.memory_space<vmem>>, vector<16x128xbf16>
    %c3 = arith.constant 3 : index
    %c0_19 = arith.constant 0 : index
    %26 = vector.load %arg6[%c3, %c0_19] : memref<16x256xf32, #tpu.memory_space<vmem>>, vector<1x128xf32>
    %cst_20 = arith.constant dense<0.000000e+00> : vector<16x128xf32>
    %27 = tpu.matmul %24, %25, %cst_20 {dimension_numbers = #tpu.dot_dimension_numbers<[1], [0], [0], [1], [0, 0, 1, 1], [], []>} : vector<16x16xbf16>, vector<16x128xbf16>, vector<16x128xf32> -> vector<16x128xf32>
    %28 = vector.broadcast %26 : vector<1x128xf32> to vector<16x128xf32>
    %29 = arith.addf %27, %28 : vector<16x128xf32>
    %cst_21 = arith.constant 0.000000e+00 : f32
    %30 = vector.broadcast %cst_21 : f32 to vector<16x128xf32>
    %31 = arith.maximumf %29, %30 : vector<16x128xf32>
    %c128 = arith.constant 128 : index
    %c0_22 = arith.constant 0 : index
    %32 = vector.load %arg5[%c128, %c0_22] : memref<912x128xbf16, #tpu.memory_space<vmem>>, vector<128x128xbf16>
    %c4 = arith.constant 4 : index
    %c0_23 = arith.constant 0 : index
    %33 = vector.load %arg6[%c4, %c0_23] : memref<16x256xf32, #tpu.memory_space<vmem>>, vector<1x128xf32>
    %34 = arith.truncf %31 : vector<16x128xf32> to vector<16x128xbf16>
    %cst_24 = arith.constant dense<0.000000e+00> : vector<16x128xf32>
    %35 = tpu.matmul %34, %32, %cst_24 {dimension_numbers = #tpu.dot_dimension_numbers<[1], [0], [0], [1], [0, 0, 1, 1], [], []>} : vector<16x128xbf16>, vector<128x128xbf16>, vector<16x128xf32> -> vector<16x128xf32>
    %36 = vector.broadcast %33 : vector<1x128xf32> to vector<16x128xf32>
    %37 = arith.addf %35, %36 : vector<16x128xf32>
    %cst_25 = arith.constant 0.000000e+00 : f32
    %38 = vector.broadcast %cst_25 : f32 to vector<16x128xf32>
    %39 = arith.maximumf %37, %38 : vector<16x128xf32>
    %c256 = arith.constant 256 : index
    %c0_26 = arith.constant 0 : index
    %40 = vector.load %arg5[%c256, %c0_26] : memref<912x128xbf16, #tpu.memory_space<vmem>>, vector<128x128xbf16>
    %c5 = arith.constant 5 : index
    %c0_27 = arith.constant 0 : index
    %41 = vector.load %arg6[%c5, %c0_27] : memref<16x256xf32, #tpu.memory_space<vmem>>, vector<1x128xf32>
    %42 = arith.truncf %39 : vector<16x128xf32> to vector<16x128xbf16>
    %cst_28 = arith.constant dense<0.000000e+00> : vector<16x128xf32>
    %43 = tpu.matmul %42, %40, %cst_28 {dimension_numbers = #tpu.dot_dimension_numbers<[1], [0], [0], [1], [0, 0, 1, 1], [], []>} : vector<16x128xbf16>, vector<128x128xbf16>, vector<16x128xf32> -> vector<16x128xf32>
    %44 = vector.broadcast %41 : vector<1x128xf32> to vector<16x128xf32>
    %45 = arith.addf %43, %44 : vector<16x128xf32>
    %cst_29 = arith.constant 0.000000e+00 : f32
    %46 = vector.broadcast %cst_29 : f32 to vector<16x128xf32>
    %47 = arith.maximumf %45, %46 : vector<16x128xf32>
    %48 = arith.truncf %23 : vector<16x128xf32> to vector<16x128xbf16>
    %c384 = arith.constant 384 : index
    %c0_30 = arith.constant 0 : index
    %49 = vector.load %arg5[%c384, %c0_30] : memref<912x128xbf16, #tpu.memory_space<vmem>>, vector<128x128xbf16>
    %cst_31 = arith.constant dense<0.000000e+00> : vector<16x128xf32>
    %50 = tpu.matmul %48, %49, %cst_31 {dimension_numbers = #tpu.dot_dimension_numbers<[1], [0], [0], [1], [0, 0, 1, 1], [], []>} : vector<16x128xbf16>, vector<128x128xbf16>, vector<16x128xf32> -> vector<16x128xf32>
    %51 = arith.truncf %47 : vector<16x128xf32> to vector<16x128xbf16>
    %c512 = arith.constant 512 : index
    %c0_32 = arith.constant 0 : index
    %52 = vector.load %arg5[%c512, %c0_32] : memref<912x128xbf16, #tpu.memory_space<vmem>>, vector<128x128xbf16>
    %cst_33 = arith.constant dense<0.000000e+00> : vector<16x128xf32>
    %53 = tpu.matmul %51, %52, %cst_33 {dimension_numbers = #tpu.dot_dimension_numbers<[1], [0], [0], [1], [0, 0, 1, 1], [], []>} : vector<16x128xbf16>, vector<128x128xbf16>, vector<16x128xf32> -> vector<16x128xf32>
    %54 = arith.addf %50, %53 : vector<16x128xf32>
    %c6 = arith.constant 6 : index
    %c0_34 = arith.constant 0 : index
    %55 = vector.load %arg6[%c6, %c0_34] : memref<16x256xf32, #tpu.memory_space<vmem>>, vector<1x128xf32>
    %56 = vector.broadcast %55 : vector<1x128xf32> to vector<16x128xf32>
    %57 = arith.addf %54, %56 : vector<16x128xf32>
    %cst_35 = arith.constant 0.000000e+00 : f32
    %58 = vector.broadcast %cst_35 : f32 to vector<16x128xf32>
    %59 = arith.maximumf %57, %58 : vector<16x128xf32>
    %c640 = arith.constant 640 : index
    %c0_36 = arith.constant 0 : index
    %60 = vector.load %arg5[%c640, %c0_36] : memref<912x128xbf16, #tpu.memory_space<vmem>>, vector<128x128xbf16>
    %c7 = arith.constant 7 : index
    %c0_37 = arith.constant 0 : index
    %61 = vector.load %arg6[%c7, %c0_37] : memref<16x256xf32, #tpu.memory_space<vmem>>, vector<1x128xf32>
    %62 = arith.truncf %59 : vector<16x128xf32> to vector<16x128xbf16>
    %cst_38 = arith.constant dense<0.000000e+00> : vector<16x128xf32>
    %63 = tpu.matmul %62, %60, %cst_38 {dimension_numbers = #tpu.dot_dimension_numbers<[1], [0], [0], [1], [0, 0, 1, 1], [], []>} : vector<16x128xbf16>, vector<128x128xbf16>, vector<16x128xf32> -> vector<16x128xf32>
    %64 = vector.broadcast %61 : vector<1x128xf32> to vector<16x128xf32>
    %65 = arith.addf %63, %64 : vector<16x128xf32>
    %cst_39 = arith.constant 0.000000e+00 : f32
    %66 = vector.broadcast %cst_39 : f32 to vector<16x128xf32>
    %67 = arith.maximumf %65, %66 : vector<16x128xf32>
    %c768 = arith.constant 768 : index
    %c0_40 = arith.constant 0 : index
    %68 = vector.load %arg5[%c768, %c0_40] : memref<912x128xbf16, #tpu.memory_space<vmem>>, vector<128x128xbf16>
    %c8 = arith.constant 8 : index
    %c0_41 = arith.constant 0 : index
    %69 = vector.load %arg6[%c8, %c0_41] : memref<16x256xf32, #tpu.memory_space<vmem>>, vector<1x128xf32>
    %70 = arith.truncf %67 : vector<16x128xf32> to vector<16x128xbf16>
    %cst_42 = arith.constant dense<0.000000e+00> : vector<16x128xf32>
    %71 = tpu.matmul %70, %68, %cst_42 {dimension_numbers = #tpu.dot_dimension_numbers<[1], [0], [0], [1], [0, 0, 1, 1], [], []>} : vector<16x128xbf16>, vector<128x128xbf16>, vector<16x128xf32> -> vector<16x128xf32>
    %72 = vector.broadcast %69 : vector<1x128xf32> to vector<16x128xf32>
    %73 = arith.addf %71, %72 : vector<16x128xf32>
    %cst_43 = arith.constant 0.000000e+00 : f32
    %74 = vector.broadcast %cst_43 : f32 to vector<16x128xf32>
    %75 = arith.maximumf %73, %74 : vector<16x128xf32>
    %c9 = arith.constant 9 : index
    %c0_44 = arith.constant 0 : index
    %76 = vector.load %arg6[%c9, %c0_44] : memref<16x256xf32, #tpu.memory_space<vmem>>, vector<1x128xf32>
    %c10 = arith.constant 10 : index
    %c0_45 = arith.constant 0 : index
    %77 = vector.load %arg6[%c10, %c0_45] : memref<16x256xf32, #tpu.memory_space<vmem>>, vector<1x1xf32>
    %78 = vector.broadcast %76 : vector<1x128xf32> to vector<16x128xf32>
    %79 = arith.mulf %75, %78 : vector<16x128xf32>
    %cst_46 = arith.constant dense<0.000000e+00> : vector<16xf32>
    %80 = vector.multi_reduction <add>, %79, %cst_46 [1] : vector<16x128xf32> to vector<16xf32>
    %81 = vector.shape_cast %80 : vector<16xf32> to vector<16x1xf32>
    %82 = vector.broadcast %77 : vector<1x1xf32> to vector<16x1xf32>
    %83 = arith.addf %81, %82 : vector<16x1xf32>
    %c0_47 = arith.constant 0 : index
    %c0_48 = arith.constant 0 : index
    %84 = vector.load %arg7[%c0_47, %c0_48] : memref<16x1xf32, #tpu.memory_space<vmem>>, vector<16x1xf32>
    tpu.vector_store %arg7[%c0_47, %c0_48], %83 {strides = array<i32>} : memref<16x1xf32, #tpu.memory_space<vmem>>, vector<16x1xf32>,
    return
  }
  func.func @transform_0(%arg0: i32) -> (i32, i32) {
    %c0_i32 = arith.constant 0 : i32
    %c0_i32_0 = arith.constant 0 : i32
    return %arg0, %c0_i32 : i32, i32
  }
  func.func @transform_1(%arg0: i32) -> (i32, i32) {
    %c0_i32 = arith.constant 0 : i32
    %c0_i32_0 = arith.constant 0 : i32
    return %arg0, %c0_i32 : i32, i32
  }
  func.func @transform_2(%arg0: i32) -> (i32, i32) {
    %c0_i32 = arith.constant 0 : i32
    %c0_i32_0 = arith.constant 0 : i32
    %c0_i32_1 = arith.constant 0 : i32
    return %c0_i32, %c0_i32_0 : i32, i32
  }
  func.func @transform_3(%arg0: i32) -> (i32, i32) {
    %c0_i32 = arith.constant 0 : i32
    %c0_i32_0 = arith.constant 0 : i32
    %c0_i32_1 = arith.constant 0 : i32
    return %c0_i32, %c0_i32_0 : i32, i32
  }
  func.func @transform_4(%arg0: i32) -> (i32, i32) {
    %c0_i32 = arith.constant 0 : i32
    %c0_i32_0 = arith.constant 0 : i32
    %c0_i32_1 = arith.constant 0 : i32
    return %c0_i32, %c0_i32_0 : i32, i32
  }
  func.func @transform_5(%arg0: i32) -> (i32, i32) {
    %c0_i32 = arith.constant 0 : i32
    %c0_i32_0 = arith.constant 0 : i32
    %c0_i32_1 = arith.constant 0 : i32
    return %c0_i32, %c0_i32_0 : i32, i32
  }
  func.func @transform_6(%arg0: i32) -> (i32, i32) {
    %c0_i32 = arith.constant 0 : i32
    %c0_i32_0 = arith.constant 0 : i32
    return %arg0, %c0_i32 : i32, i32
  }
}

</mosaic_0001>

<bundles_post_ra>
// kernel: tpu_custom_call.1
= control target key start
LH: loop header
LB: loop body
LE: loop exit
PB: predicated region body
PF: predicated region fallthrough
CT: control target
= control target key end

     0   :  { %11 = vsyncpa [#allocation3], 0  ;;  %s3498_s0 = inlined_call_operand.hbm [shape: bf16[32,768], index: 0, kind: input, shape index: {}]   ;;  %s3499_s1 = inlined_call_operand.vmem [shape: bf16[32,16], index: 1, kind: input, shape index: {}]   ;;  %s3500_s2 = inlined_call_operand.hbm [shape: bf16[768,256], index: 2, kind: input, shape index: {}]   ;;  %s3501_s3 = inlined_call_operand.hbm [shape: bf16[256,128], index: 3, kind: input, shape index: {}]   ;;  %s3502_s4 = inlined_call_operand.hbm [shape: bf16[912,128], index: 4, kind: input, shape index: {}]   ;;  %s3503_s5 = inlined_call_operand.vmem [shape: f32[16,256], index: 5, kind: input, shape index: {}]   ;;  %s3504_s6 = inlined_call_operand.vmem [shape: f32[32,1], index: 6, kind: output, shape index: {}]  }
   0x1   :  { %13 = vsyncpa [#allocation3 + $0x1], 0 }
   0x2   :  { %14 = vsyncpa [#allocation5], 0 }
   0x3   :  { %15 = vsyncpa [#allocation8], 0  ;;  %s3174_s21 = smov 0   ;;  %s3176_s22 = smov 0  }
   0x4   :  { %s3178_s23 = smov 0   ;;  %s3180_s24 = smov 0  }
   0x5 LB: > { %s2219_s25 = sadd.s32 4294967295, %s3125_s24   ;;  %p41_p0 = scmp.ne.s32.totalorder %s3117_s22, %s3113_s21  ;;  %s3125_s24 = sphi %s3180_s24, %s3521_s24   ;;  %s3121_s23 = sphi %s3178_s23, %s3520_s23   ;;  %s3117_s22 = sphi %s3176_s22, %s3519_s22   ;;  %s3113_s21 = sphi %s3174_s21, %s3518_s21  }
   0x6   : > { %p3196_p1 = scmp.eq.s32.totalorder %s2219_s25, 0  ;;  %p2221_p2 = scmp.ge.s32.totalorder %s3125_s24, 1 }
   0x7   : > { %p188_p3 = scmp.lt.s32.totalorder %s3125_s24, 3  ;;  %s3127_s29 = smov [#allocation4]  }
   0x8   : > { %s3509_s26 = scalar_select %p3196_p1, 1, 0 }
   0x9   : > { %p3204_p4 = por %p3196_p1, %p41_p0  ;;  %p3208_p5 = pnand %p2221_p2, %p188_p3 }
   0xa   : > { %s200_s30 = sshll.u32 %s3127_s29, 4  ;;  %s3128_s8 = smov [#allocation6]   ;;  %s201_s30 = int_to_ptr.vmem [resolvable:$true] %s200_s30 }
   0xb   : > { %s3510_s27 = scalar_select %p3204_p4, 1, 0 }
   0xc   : > { %s3511_s28 = scalar_select %p3208_p5, 1, 0 }
   0xd   : > { %p2678_p6 = pneg %p3208_p5  ;;  %s213_s9 = sshll.u32 %s3128_s8, 4  ;;  %s3220_s9 = int_to_ptr.vmem [resolvable:$true] %s213_s9 }
   0xe   : > { %s2969_s12 = scalar_lea.hbm %s3500_s2, 12288 }
   0xf   : > { %p3216_p7 = pnand %p2678_p6, %p3196_p1  ;;  %p2970_p8 = scmp.ne.s32.totalorder %s3500_s2, %s2969_s12 }
  0x10   : > { %p2976_p12 = scmp.lt.u32.totalorder %s2969_s12, %s3500_s2 }
  0x11   : > { %p3230_p9 = pneg %p3216_p7 }
  0x13   : > { %p2972_p10 = pnand %p3230_p9, %p2970_p8 }
  0x15   : > { %p2973_p11 = pneg %p2972_p10 }
  0x17   : > { %p2978_p13 = pnand %p2976_p12, %p2973_p11 }
  0x19   : > { %2981 = shalt.err (!%p2978_p13)
}
  0x1a   : > { %s2982_s18 = scalar_lea.vmem %s201_s30, 12288  ;;  %p2990_p6 = scmp.lt.s32.totalorder %s201_s30, %s201_s30 }
  0x1b   : > { %p2983_p0 = scmp.ne.s32.totalorder %s201_s30, %s2982_s18  ;;  %p2991_p1 = scmp.lt.s32.totalorder %s2982_s18, %s2982_s18 }
  0x1d   : > { %p2985_p2 = pnand %p2983_p0, %p3230_p9  ;;  %p2992_p4 = por %p2991_p1, %p2990_p6 }
  0x1f   : > { %p2986_p3 = pneg %p2985_p2 }
  0x21   : > { %p2993_p5 = pnand %p2992_p4, %p2986_p3 }
  0x23   : > { %2996 = shalt.err (!%p2993_p5)
}
  0x24   : > { %s3129_s19 = smov 128   ;;  %s3130_s20 = smov 8  }
  0x25   : > { %2681 = dma.hbm_to_vmem [thread:$0]  (!%p3216_p7), %s3500_s2, 12288, %s201_s30, [#allocation5], %s3129_s19, %s3129_s19, %s3130_s20  }
  0x26   : > { %s2997_s11 = scalar_lea.hbm %s3501_s3, 2048 }
  0x27   : > { %p2998_p8 = scmp.ne.s32.totalorder %s3501_s3, %s2997_s11  ;;  %p3004_p5 = scmp.lt.u32.totalorder %s2997_s11, %s3501_s3 }
  0x29   : > { %p3000_p1 = pnand %p2998_p8, %p3230_p9 }
  0x2b   : > { %p3001_p4 = pneg %p3000_p1 }
  0x2d   : > { %p3006_p10 = pnand %p3004_p5, %p3001_p4 }
  0x2f   : > { %3009 = shalt.err (!%p3006_p10)
}
  0x30   : > { %s3010_s30 = scalar_lea.vmem %s3220_s9, 2048  ;;  %p3018_p0 = scmp.lt.s32.totalorder %s3220_s9, %s3220_s9 }
  0x31   : > { %p3011_p11 = scmp.ne.s32.totalorder %s3220_s9, %s3010_s30  ;;  %p3019_p2 = scmp.lt.s32.totalorder %s3010_s30, %s3010_s30 }
  0x33   : > { %p3013_p12 = pnand %p3011_p11, %p3230_p9  ;;  %p3020_p3 = por %p3019_p2, %p3018_p0 }
  0x35   : > { %p3014_p13 = pneg %p3013_p12 }
  0x37   : > { %p3021_p6 = pnand %p3020_p3, %p3014_p13 }
  0x39   : > { %3024 = shalt.err (!%p3021_p6)
}
  0x3a   : > { %s3131_s17 = smov 64   ;;  %s3132_s18 = smov 4  }
  0x3b   : > { %2684 = dma.hbm_to_vmem [thread:$0]  (!%p3216_p7), %s3501_s3, 2048, %s3220_s9, [#allocation5], %s3131_s17, %s3131_s17, %s3132_s18  }
  0x3c   : > { %s3133_s21 = smov [#allocation7]   ;;  %s3270_s8 = sadd.s32 1, %s3125_s24  }
  0x3d   : > { %s226_s29 = sshll.u32 %s3133_s21, 4  ;;  %s3025_s12 = scalar_lea.hbm %s3502_s4, 7296  ;;  %s227_s29 = int_to_ptr.vmem [resolvable:$true] %s226_s29 }
  0x3e   : > { %p3026_p8 = scmp.ne.s32.totalorder %s3502_s4, %s3025_s12  ;;  %p3032_p5 = scmp.lt.u32.totalorder %s3025_s12, %s3502_s4 }
  0x40   : > { %p3028_p1 = pnand %p3026_p8, %p3230_p9 }
  0x42   : > { %p3029_p4 = pneg %p3028_p1 }
  0x44   : > { %p3034_p10 = pnand %p3032_p5, %p3029_p4 }
  0x46   : > { %3037 = shalt.err (!%p3034_p10)
}
  0x47   : > { %s3038_s9 = scalar_lea.vmem %s227_s29, 7296  ;;  %p3046_p0 = scmp.lt.s32.totalorder %s227_s29, %s227_s29 }
  0x48   : > { %p3039_p11 = scmp.ne.s32.totalorder %s227_s29, %s3038_s9  ;;  %p3047_p2 = scmp.lt.s32.totalorder %s3038_s9, %s3038_s9 }
  0x4a   : > { %p3041_p12 = pnand %p3039_p11, %p3230_p9  ;;  %p3048_p3 = por %p3047_p2, %p3046_p0 }
  0x4c   : > { %p3042_p13 = pneg %p3041_p12 }
  0x4e   : > { %p3049_p6 = pnand %p3048_p3, %p3042_p13 }
  0x50   : > { %3052 = shalt.err (!%p3049_p6)
}
  0x51   : > { %2687 = dma.hbm_to_vmem [thread:$0]  (!%p3216_p7), %s3502_s4, 7296, %s227_s29, [#allocation8], %s3131_s17, %s3131_s17, %s3132_s18  }
  0x52   : > { %s25_s15 = ssub.s32 %s3125_s24, %s3270_s8  ;;  %s28_s21 = sadd.s32 1, %s3121_s23 }
  0x53   : > { %p26_p9 = scmp.eq.s32.totalorder %s25_s15, 0  ;;  %p35_p8 = scmp.ne.s32.totalorder %s3121_s23, %s3117_s22 }
  0x54   : > { %p36_p1 = scmp.eq.s32.totalorder %s3125_s24, 0  ;;  %p2695_p4 = scmp.lt.s32.totalorder %s3125_s24, 2 }
  0x55   : > { %s3298_s7 = scalar_select %p26_p9, %s3121_s23, %s28_s21  }
  0x56   : > { %p37_p5 = por %p36_p1, %p35_p8  ;;  %s243_s10 = sand.u32 1, %s3121_s23  }
  0x57   : > { %s2661_s11 = smul.u32 48, %s243_s10  ;;  %s3313_s30 = scalar_lea.sflag [#allocation3], %s243_s10 }
  0x58   : > { %s2662_s12 = smul.u32 768, %s3125_s24  ;;  %p3302_p10 = pnand %p2695_p4, %p37_p5 }
  0x59   : > { %s247_s18 = scalar_lea.vmem [#allocation2], %s2661_s11  ;;  %s3058_s15 = scalar_lea.hbm %s3498_s0, 1536 }
  0x5a   : > { %s3309_s17 = scalar_lea.hbm %s3498_s0, %s2662_s12  ;;  %s255_s29 = sshll.u32 %s247_s18, 4  ;;  %s3311_s29 = int_to_ptr.vmem [resolvable:$true] %s255_s29 }
  0x5b   : > { %s3053_s9 = scalar_lea.hbm %s3309_s17, 768  ;;  %p3055_p11 = pneg %p3302_p10 }
  0x5c   : > { %p3054_p7 = scmp.ne.s32.totalorder %s3309_s17, %s3053_s9  ;;  %p3059_p0 = scmp.lt.u32.totalorder %s3309_s17, %s3498_s0 }
  0x5d   : > { %p3060_p2 = scmp.lt.u32.totalorder %s3058_s15, %s3053_s9  ;;  %p3062_p6 = scmp.lt.u32.totalorder %s3053_s9, %s3309_s17 }
  0x5e   : > { %p3056_p12 = pnand %p3055_p11, %p3054_p7 }
  0x5f   : > { %p3061_p3 = por %p3060_p2, %p3059_p0 }
  0x60   : > { %p3057_p13 = pneg %p3056_p12 }
  0x61   : > { %p3063_p9 = por %p3062_p6, %p3061_p3 }
  0x63   : > { %p3064_p8 = pnand %p3063_p9, %p3057_p13 }
  0x65   : > { %3067 = shalt.err (!%p3064_p8)
}
  0x66   : > { %s3068_s10 = scalar_lea.vmem %s3311_s29, 768  ;;  %s3134_s11 = smov [#allocation2]  }
  0x67   : > { %p3069_p1 = scmp.ne.s32.totalorder %s3311_s29, %s3068_s10  ;;  %s3073_s14 = sshll.u32 %s3134_s11, 4  ;;  %s3074_s14 = int_to_ptr.vmem [resolvable:$false] %s3073_s14 }
  0x68   : > { %s3075_s16 = scalar_lea.vmem %s3074_s14, 1536  ;;  %p3076_p7 = scmp.lt.s32.totalorder %s3311_s29, %s3074_s14 }
  0x69   : > { %p3071_p4 = pnand %p3069_p1, %p3055_p11  ;;  %p3077_p12 = scmp.lt.s32.totalorder %s3075_s16, %s3068_s10 }
  0x6b   : > { %p3072_p5 = pneg %p3071_p4  ;;  %p3078_p0 = por %p3077_p12, %p3076_p7 }
  0x6d   : > { %p3079_p2 = pnand %p3078_p0, %p3072_p5 }
  0x6f   : > { %3082 = shalt.err (!%p3079_p2)
}
  0x70   : > { %s3135_s18 = smov 384   ;;  %s3136_s9 = smov 24  }
  0x71   : > { %2691 = dma.hbm_to_vmem [thread:$0]  (!%p3302_p10), %s3309_s17, 768, %s3311_s29, %s3313_s30, %s3135_s18, %s3135_s18, %s3136_s9  }
  0x72   : > { %p3515_p11 = scmp.ne.s32.totalorder %s3511_s28, 0 }
  0x73   : > { %s278_s19 = sand.u32 (!%p3515_p11), 1, %s3117_s22   ;;  %p3516_p13 = scmp.ne.s32.totalorder (!%p3515_p11), %s3510_s27, 0 }
  0x74   : > { %276 = sbr.rel (%p3515_p11) target bundleno = 2276 (0x8e4), region = 44  ;;  %s279_s15 = scalar_lea.sflag (!%p3515_p11), [#allocation3], %s278_s19 }
  0x75   : > { %s2663_s20 = smul.u32 (!%p3515_p11), 48, %s278_s19 }
  0x77   : > { %s3344_s21 = scalar_lea.vmem (!%p3515_p11), [#allocation2], %s2663_s20 }
  0x7b   : > { %3100 = dma.done.wait (%p3516_p13), %s279_s15, 768  }
  0x7c   : > { %3102 = vsyncadd (%p3516_p13), %s279_s15, 4294966528  ;;  %p3517_p3 = scmp.ne.s32.totalorder %s3509_s26, 0 }
  0x7e   : > { %3104 = dma.done.wait (%p3517_p3), [#allocation5], 14336  }
  0x7f   : > { %3106 = vsyncadd (%p3517_p3), [#allocation5], 4294952960 }
  0x80   : > { %3108 = dma.done.wait (%p3517_p3), [#allocation8], 7296  }
  0x81   : > { %3110 = vsyncadd (%p3517_p3), [#allocation8], 4294960000  ;;  %v2742_v0 = vld [vmem:[#allocation4 + $0x4] ss:$8 sps:$4 sm:$0xff]   ;;  %v2744_v1 = vld [vmem:[#allocation4] ss:$8 sps:$4 sm:$0xff]  }
  0x82   : > { %966 = vmatprep.subr.bf16.mxu0 %v2742_v0  ;;  %v2745_v2 = vld [vmem:[#allocation4 + $0x14] ss:$8 sps:$4 sm:$0xff]   ;;  %v2747_v3 = vld [vmem:[#allocation4 + $0x10] ss:$8 sps:$4 sm:$0xff]   ;;  %v2748_v4 = vld [vmem:[#allocation4 + $0x24] ss:$8 sps:$4 sm:$0xff]  }
  0x83   : > { %967 = vmatpush1.bf16.msra.mxu0 %v2744_v1  ;;  %v2750_v5 = vld [vmem:[#allocation4 + $0x20] ss:$8 sps:$4 sm:$0xff]   ;;  %v2751_v6 = vld [vmem:[#allocation4 + $0x34] ss:$8 sps:$4 sm:$0xff]   ;;  %v2753_v7 = vld [vmem:[#allocation4 + $0x30] ss:$8 sps:$4 sm:$0xff]  }
  0x84   : > { %968 = vmatprep.subr.bf16.mxu0 %v2745_v2  ;;  %v2754_v8 = vld [vmem:[#allocation4 + $0x44] ss:$8 sps:$4 sm:$0xff]   ;;  %v2756_v9 = vld [vmem:[#allocation4 + $0x40] ss:$8 sps:$4 sm:$0xff]   ;;  %v2757_v10 = vld [vmem:[#allocation4 + $0x54] ss:$8 sps:$4 sm:$0xff]  }
  0x85   : > { %v2759_v11 = vld [vmem:[#allocation4 + $0x50] ss:$8 sps:$4 sm:$0xff]   ;;  %v2760_v12 = vld [vmem:[#allocation4 + $0x64] ss:$8 sps:$4 sm:$0xff]   ;;  %v2762_v14 = vld [vmem:[#allocation4 + $0x60] ss:$8 sps:$4 sm:$0xff]  }
  0x86   : > { %v2792_v13 = vld [vmem:[%s3344_s21 + $0x4] ss:$24 sps:$4 sm:$0xff]   ;;  %v2765_v16 = vld [vmem:[#allocation4 + $0x70] ss:$8 sps:$4 sm:$0xff]   ;;  %v2768_v18 = vld [vmem:[#allocation4 + $0x80] ss:$8 sps:$4 sm:$0xff]  }
  0x87   : > { %969 = vmatpush1.bf16.msra.mxu0 %v2747_v3  ;;  %v2763_v15 = vld [vmem:[#allocation4 + $0x74] ss:$8 sps:$4 sm:$0xff]   ;;  %998 = vmatprep.mubr.bf16.mxu0 %v2792_v13  ;;  %v2766_v17 = vld [vmem:[#allocation4 + $0x84] ss:$8 sps:$4 sm:$0xff]   ;;  %v2771_v20 = vld [vmem:[#allocation4 + $0x90] ss:$8 sps:$4 sm:$0xff]  }
  0x88   : > { %970 = vmatprep.subr.bf16.mxu0 %v2748_v4  ;;  %v2769_v19 = vld [vmem:[#allocation4 + $0x94] ss:$8 sps:$4 sm:$0xff]   ;;  %v2772_v21 = vld [vmem:[#allocation4 + $0xa4] ss:$8 sps:$4 sm:$0xff]   ;;  %v2774_v22 = vld [vmem:[#allocation4 + $0xa0] ss:$8 sps:$4 sm:$0xff]  }
  0x89   : > { %v2775_v23 = vld [vmem:[#allocation4 + $0xb4] ss:$8 sps:$4 sm:$0xff]   ;;  %v2777_v24 = vld [vmem:[#allocation4 + $0xb0] ss:$8 sps:$4 sm:$0xff]   ;;  %v2778_v25 = vld [vmem:[#allocation4 + $0xc4] ss:$8 sps:$4 sm:$0xff]  }
  0x8a   : > { %v2780_v26 = vld [vmem:[#allocation4 + $0xc0] ss:$8 sps:$4 sm:$0xff]   ;;  %v2781_v27 = vld [vmem:[#allocation4 + $0xd4] ss:$8 sps:$4 sm:$0xff]   ;;  %v2783_v28 = vld [vmem:[#allocation4 + $0xd0] ss:$8 sps:$4 sm:$0xff]  }
  0x8b   : > { %971 = vmatpush1.bf16.msra.mxu0 %v2750_v5  ;;  %v2784_v29 = vld [vmem:[#allocation4 + $0xe4] ss:$8 sps:$4 sm:$0xff]   ;;  %v2786_v30 = vld [vmem:[#allocation4 + $0xe0] ss:$8 sps:$4 sm:$0xff]   ;;  %v2787_v31 = vld [vmem:[#allocation4 + $0xf4] ss:$8 sps:$4 sm:$0xff]  }
  0x8c   : > { %972 = vmatprep.subr.bf16.mxu0 %v2751_v6  ;;  %v2789_v32 = vld [vmem:[#allocation4 + $0xf0] ss:$8 sps:$4 sm:$0xff]   ;;  %v2795_v33 = vld [vmem:[#allocation4 + $0x104] ss:$8 sps:$4 sm:$0xff]   ;;  %v2793_v35 = vld [vmem:[#allocation4 + $0x100] ss:$8 sps:$4 sm:$0xff]  }
  0x8d   : > { %v2790_v34 = vld [vmem:[%s3344_s21] ss:$24 sps:$4 sm:$0xff]   ;;  %v2843_v36 = vld [vmem:[%s3344_s21 + $0xc] ss:$24 sps:$4 sm:$0xff]   ;;  %vm3138_vm0 = vmmov 0   ;;  %s2233_s28 = sshll.u32 %s2219_s25, 1 }
  0x8e   : > { %v2798_v37 = vld [vmem:[#allocation4 + $0x114] ss:$8 sps:$4 sm:$0xff]   ;;  %v2796_v38 = vld [vmem:[#allocation4 + $0x110] ss:$8 sps:$4 sm:$0xff]   ;;  %v2801_v39 = vld [vmem:[#allocation4 + $0x124] ss:$8 sps:$4 sm:$0xff]  }
  0x8f   : > { %973 = vmatpush1.bf16.msra.mxu0 %v2753_v7  ;;  %v2895_v40 = vld [vmem:[#allocation6 + $0x40] sm:$0xff]   ;;  %v2804_v43 = vld [vmem:[#allocation4 + $0x134] ss:$8 sps:$4 sm:$0xff]   ;;  %v2897_v44 = vld [vmem:[#allocation6 + $0x48] sm:$0xff]   ;;  %p330_p10 = scmp.lt.s32.totalorder %s2233_s28, 3  ;;  %vm1398_vm1 = vcmask 130048  }
  0x90   : > { %974 = vmatprep.subr.bf16.mxu0 %v2754_v8  ;;  %v2799_v41 = vld [vmem:[#allocation4 + $0x120] ss:$8 sps:$4 sm:$0xff]   ;;  %2416 = vmatprep.subr.bf16.mxu1 %v2895_v40  ;;  %v2899_v46 = vld [vmem:[#allocation6 + $0x50] sm:$0xff]   ;;  %v2807_v48 = vld [vmem:[#allocation4 + $0x144] ss:$8 sps:$4 sm:$0xff]   ;;  %vm2108_vm2 = vcmask 7168  }
  0x91   : > { %v2896_v42 = vld [vmem:[#allocation6] sm:$0xff]   ;;  %v2898_v45 = vld [vmem:[#allocation6 + $0x8] sm:$0xff]   ;;  %v2802_v47 = vld [vmem:[#allocation4 + $0x130] ss:$8 sps:$4 sm:$0xff]   ;;  %s3523_s28 = smov (!%p330_p10, %s2233_s28), 3 }
  0x92   : > { %2417 = vmatpush3.bf16.msra.mxu1 %v2896_v42  ;;  %v2900_v49 = vld [vmem:[#allocation6 + $0x10] sm:$0xff]   ;;  %v2901_v50 = vld [vmem:[#allocation6 + $0x58] sm:$0xff]   ;;  %v2805_v51 = vld [vmem:[#allocation4 + $0x140] ss:$8 sps:$4 sm:$0xff]   ;;  %s2234_s13 = sshll.u32 %s3523_s28, 2 }
  0x93   : > { %975 = vmatpush1.bf16.msra.mxu0 %v2756_v9  ;;  %2418 = vmatprep.subr.bf16.mxu1 %v2897_v44  ;;  %v2810_v52 = vld [vmem:[#allocation4 + $0x154] ss:$8 sps:$4 sm:$0xff]   ;;  %v2903_v54 = vld [vmem:[#allocation6 + $0x60] sm:$0xff]   ;;  %v2808_v55 = vld [vmem:[#allocation4 + $0x150] ss:$8 sps:$4 sm:$0xff]   ;;  %s333_s30 = scalar_lea.vmem %s3499_s1, %s2234_s13 }
  0x94   : > { %976 = vmatprep.subr.bf16.mxu0 %v2757_v10  ;;  %v2902_v53 = vld [vmem:[#allocation6 + $0x18] sm:$0xff]   ;;  %v2904_v56 = vld [vmem:[#allocation6 + $0x20] sm:$0xff]   ;;  %v2905_v58 = vld [vmem:[#allocation6 + $0x68] sm:$0xff]  }
  0x95   : > { %v2813_v57 = vld [vmem:[#allocation4 + $0x164] ss:$8 sps:$4 sm:$0xff]   ;;  %v2811_v59 = vld [vmem:[#allocation4 + $0x160] ss:$8 sps:$4 sm:$0xff]   ;;  %v2816_v60 = vld [vmem:[#allocation4 + $0x174] ss:$8 sps:$4 sm:$0xff]  }
  0x96   : > { %2419 = vmatpush3.bf16.msra.mxu1 %v2898_v45  ;;  %v2814_v61 = vld [vmem:[#allocation4 + $0x170] ss:$8 sps:$4 sm:$0xff]   ;;  %v2819_v62 = vld [vmem:[#allocation4 + $0x184] ss:$8 sps:$4 sm:$0xff]   ;;  %v2817_v63 = vld [vmem:[#allocation4 + $0x180] ss:$8 sps:$4 sm:$0xff]  }
  0x97   : > { %977 = vmatpush1.bf16.msra.mxu0 %v2759_v11  ;;  %2420 = vmatprep.subr.bf16.mxu1 %v2899_v46  ;;  %v2822_v0 = vld [vmem:[#allocation4 + $0x194] ss:$8 sps:$4 sm:$0xff]   ;;  %v2820_v1 = vld [vmem:[#allocation4 + $0x190] ss:$8 sps:$4 sm:$0xff]   ;;  %v2825_v2 = vld [vmem:[#allocation4 + $0x1a4] ss:$8 sps:$4 sm:$0xff]  }
  0x98   : > { %978 = vmatprep.subr.bf16.mxu0 %v2760_v12  ;;  %v2823_v3 = vld [vmem:[#allocation4 + $0x1a0] ss:$8 sps:$4 sm:$0xff]   ;;  %v2828_v4 = vld [vmem:[#allocation4 + $0x1b4] ss:$8 sps:$4 sm:$0xff]   ;;  %v2826_v5 = vld [vmem:[#allocation4 + $0x1b0] ss:$8 sps:$4 sm:$0xff]  }
  0x99   : > { %v2831_v6 = vld [vmem:[#allocation4 + $0x1c4] ss:$8 sps:$4 sm:$0xff]   ;;  %v2829_v7 = vld [vmem:[#allocation4 + $0x1c0] ss:$8 sps:$4 sm:$0xff]   ;;  %v2834_v8 = vld [vmem:[#allocation4 + $0x1d4] ss:$8 sps:$4 sm:$0xff]  }
  0x9a   : > { %2421 = vmatpush3.bf16.msra.mxu1 %v2900_v49  ;;  %v2832_v9 = vld [vmem:[#allocation4 + $0x1d0] ss:$8 sps:$4 sm:$0xff]   ;;  %v2837_v10 = vld [vmem:[#allocation4 + $0x1e4] ss:$8 sps:$4 sm:$0xff]   ;;  %v2835_v11 = vld [vmem:[#allocation4 + $0x1e0] ss:$8 sps:$4 sm:$0xff]  }
  0x9b   : > { %979 = vmatpush1.bf16.msra.mxu0 %v2762_v14  ;;  %2422 = vmatprep.subr.bf16.mxu1 %v2901_v50  ;;  %v2840_v12 = vld [vmem:[#allocation4 + $0x1f4] ss:$8 sps:$4 sm:$0xff]   ;;  %v2838_v13 = vld [vmem:[#allocation4 + $0x1f0] ss:$8 sps:$4 sm:$0xff]   ;;  %v2846_v14 = vld [vmem:[#allocation4 + $0x204] ss:$8 sps:$4 sm:$0xff]  }
  0x9c   : > { %980 = vmatprep.subr.bf16.mxu0 %v2763_v15  ;;  %v2841_v15 = vld [vmem:[%s3344_s21 + $0x8] ss:$24 sps:$4 sm:$0xff]   ;;  %v2882_v40 = vld [vmem:[#allocation4 + $0x2c4] ss:$8 sps:$4 sm:$0xff]   ;;  %v2885_v42 = vld [vmem:[#allocation4 + $0x2d4] ss:$8 sps:$4 sm:$0xff]  }
  0x9d   : > { %v2888_v44 = vld [vmem:[#allocation4 + $0x2e4] ss:$8 sps:$4 sm:$0xff]   ;;  %v2886_v45 = vld [vmem:[#allocation4 + $0x2e0] ss:$8 sps:$4 sm:$0xff]   ;;  %v2891_v46 = vld [vmem:[#allocation4 + $0x2f4] ss:$8 sps:$4 sm:$0xff]  }
  0x9e   : > { %2423 = vmatpush3.bf16.msra.mxu1 %v2902_v53  ;;  %v2906_v49 = vld [vmem:[#allocation6 + $0x28] sm:$0xff]   ;;  %v2907_v50 = vld [vmem:[#allocation6 + $0x70] sm:$0xff]   ;;  %v2910_v53 = vld [vmem:[#allocation6 + $0x38] sm:$0xff]  }
  0x9f   : > { %981 = vmatpush1.bf16.msra.mxu0 %v2765_v16  ;;  %2424 = vmatprep.subr.bf16.mxu1 %v2903_v54  ;;  %v2844_v16 = vld [vmem:[#allocation4 + $0x200] ss:$8 sps:$4 sm:$0xff]   ;;  %v3137_v54 = vmov 0.0  }
  0xa0   : > { %982 = vmatprep.subr.bf16.mxu0 %v2766_v17  ;;  %v2894_v17 = vld [vmem:[%s3344_s21 + $0x14] ss:$24 sps:$4 sm:$0xff]  }
  0xa2   : > { %2425 = vmatpush3.bf16.msra.mxu1 %v2904_v56 }
  0xa3   : > { %983 = vmatpush1.bf16.msra.mxu0 %v2768_v18  ;;  %2426 = vmatprep.subr.bf16.mxu1 %v2905_v58  ;;  %v2849_v18 = vld [vmem:[#allocation4 + $0x214] ss:$8 sps:$4 sm:$0xff]   ;;  %v444_v58 = vld [vmem:[%s3503_s5] ss:$8 sm:$0x3] }
  0xa4   : > { %984 = vmatprep.subr.bf16.mxu0 %v2769_v19  ;;  %v2847_v19 = vld [vmem:[#allocation4 + $0x210] ss:$8 sps:$4 sm:$0xff]  }
  0xa6   : > { %2427 = vmatpush3.bf16.msra.mxu1 %v2906_v49 }
  0xa7   : > { %985 = vmatpush1.bf16.msra.mxu0 %v2771_v20  ;;  %v2852_v20 = vld [vmem:[#allocation4 + $0x224] ss:$8 sps:$4 sm:$0xff]   ;;  %2428 = vmatprep.subr.bf16.mxu1 %v2907_v50 }
  0xa8   : > { %986 = vmatprep.subr.bf16.mxu0 %v2772_v21  ;;  %v2850_v21 = vld [vmem:[#allocation4 + $0x220] ss:$8 sps:$4 sm:$0xff]  }
  0xab   : > { %987 = vmatpush1.bf16.msra.mxu0 %v2774_v22  ;;  %v2855_v22 = vld [vmem:[#allocation4 + $0x234] ss:$8 sps:$4 sm:$0xff]  }
  0xac   : > { %988 = vmatprep.subr.bf16.mxu0 %v2775_v23  ;;  %v2853_v23 = vld [vmem:[#allocation4 + $0x230] ss:$8 sps:$4 sm:$0xff]  }
  0xaf   : > { %989 = vmatpush1.bf16.msra.mxu0 %v2777_v24  ;;  %v2858_v24 = vld [vmem:[#allocation4 + $0x244] ss:$8 sps:$4 sm:$0xff]  }
  0xb0   : > { %990 = vmatprep.subr.bf16.mxu0 %v2778_v25  ;;  %v2856_v25 = vld [vmem:[#allocation4 + $0x240] ss:$8 sps:$4 sm:$0xff]  }
  0xb3   : > { %991 = vmatpush1.bf16.msra.mxu0 %v2780_v26  ;;  %v2861_v26 = vld [vmem:[#allocation4 + $0x254] ss:$8 sps:$4 sm:$0xff]  }
  0xb4   : > { %992 = vmatprep.subr.bf16.mxu0 %v2781_v27  ;;  %v2859_v27 = vld [vmem:[#allocation4 + $0x250] ss:$8 sps:$4 sm:$0xff]  }
  0xb7   : > { %993 = vmatpush1.bf16.msra.mxu0 %v2783_v28  ;;  %v2864_v28 = vld [vmem:[#allocation4 + $0x264] ss:$8 sps:$4 sm:$0xff]  }
  0xb8   : > { %994 = vmatprep.subr.bf16.mxu0 %v2784_v29  ;;  %v2862_v29 = vld [vmem:[#allocation4 + $0x260] ss:$8 sps:$4 sm:$0xff]  }
  0xbb   : > { %995 = vmatpush1.bf16.msra.mxu0 %v2786_v30  ;;  %v2867_v30 = vld [vmem:[#allocation4 + $0x274] ss:$8 sps:$4 sm:$0xff]  }
  0xbc   : > { %996 = vmatprep.subr.bf16.mxu0 %v2787_v31  ;;  %v2865_v31 = vld [vmem:[#allocation4 + $0x270] ss:$8 sps:$4 sm:$0xff]  }
  0xbf   : > { %997 = vmatpush1.bf16.msra.mxu0 %v2789_v32  ;;  %v2870_v32 = vld [vmem:[#allocation4 + $0x284] ss:$8 sps:$4 sm:$0xff]  }
  0xc0   : > { %1009 = vmatprep.subr.bf16.mxu0 %v2795_v33  ;;  %v2868_v33 = vld [vmem:[#allocation4 + $0x280] ss:$8 sps:$4 sm:$0xff]  }
  0xc2   : > { %999 = vmatmul.mubr.bf16.vlgmr.msra.gmra.mrb[0].mxu0 %v2790_v34  ;;  %v2873_v34 = vld [vmem:[#allocation4 + $0x294] ss:$8 sps:$4 sm:$0xff]  }
  0xc3   : > { %1010 = vmatpush1.bf16.msra.mxu0 %v2793_v35  ;;  %1041 = vmatprep.mubr.bf16.mxu0 %v2843_v36  ;;  %v2871_v35 = vld [vmem:[#allocation4 + $0x290] ss:$8 sps:$4 sm:$0xff]   ;;  %v2876_v36 = vld [vmem:[#allocation4 + $0x2a4] ss:$8 sps:$4 sm:$0xff]  }
  0xc4   : > { %1011 = vmatprep.subr.bf16.mxu0 %v2798_v37  ;;  %v2874_v37 = vld [vmem:[#allocation4 + $0x2a0] ss:$8 sps:$4 sm:$0xff]  }
  0xc7   : > { %1012 = vmatpush1.bf16.msra.mxu0 %v2796_v38  ;;  %v2879_v38 = vld [vmem:[#allocation4 + $0x2b4] ss:$8 sps:$4 sm:$0xff]  }
  0xc8   : > { %1013 = vmatprep.subr.bf16.mxu0 %v2801_v39  ;;  %v2877_v39 = vld [vmem:[#allocation4 + $0x2b0] ss:$8 sps:$4 sm:$0xff]  }
  0xcb   : > { %1014 = vmatpush1.bf16.msra.mxu0 %v2799_v41  ;;  %v2880_v41 = vld [vmem:[#allocation4 + $0x2c0] ss:$8 sps:$4 sm:$0xff]  }
  0xcc   : > { %1015 = vmatprep.subr.bf16.mxu0 %v2804_v43  ;;  %v2883_v43 = vld [vmem:[#allocation4 + $0x2d0] ss:$8 sps:$4 sm:$0xff]  }
  0xcf   : > { %1016 = vmatpush1.bf16.msra.mxu0 %v2802_v47  ;;  %v2889_v47 = vld [vmem:[#allocation4 + $0x2f0] ss:$8 sps:$4 sm:$0xff]  }
  0xd0   : > { %1017 = vmatprep.subr.bf16.mxu0 %v2807_v48  ;;  %v2892_v48 = vld [vmem:[%s3344_s21 + $0x10] ss:$24 sps:$4 sm:$0xff]  }
  0xd3   : > { %1018 = vmatpush1.bf16.msra.mxu0 %v2805_v51  ;;  %v2908_v51 = vld [vmem:[#allocation6 + $0x30] sm:$0xff]  }
  0xd4   : > { %1019 = vmatprep.subr.bf16.mxu0 %v2810_v52  ;;  %2429 = vmatpush3.bf16.msra.mxu1 %v2908_v51  ;;  %v2909_v52 = vld [vmem:[#allocation6 + $0x78] sm:$0xff]   ;;  %v1386_v51 = vld [vmem:[%s3503_s5 + $0x3] ss:$0 sm:$0xff] }
  0xd5   : > { %2430 = vmatprep.subr.bf16.mxu1 %v2909_v52 }
  0xd7   : > { %1020 = vmatpush1.bf16.msra.mxu0 %v2808_v55  ;;  %v446_v55 = vlaneseq }
  0xd8   : > { %1021 = vmatprep.subr.bf16.mxu0 %v2813_v57  ;;  %2431 = vmatpush3.bf16.msra.mxu1 %v2910_v53 }
  0xd9   : > { %2503 = vmatprep.subr.bf16.mxu1 %v3137_v54  ;;  %v447_v56 = vshrl.u32 %v446_v55, 7 }
  0xdb   : > { %1022 = vmatpush1.bf16.msra.mxu0 %v2811_v59  ;;  %v448_v57 = vsub.s32 0, %v447_v56  ;;  %v452_v59 = vsub.s32 1, %v447_v56 }
  0xdc   : > { %1023 = vmatprep.subr.bf16.mxu0 %v2816_v60 }
  0xdd   : > { %v449_v60 = vrot.slane %v444_v58, %v448_v57 }
  0xdf   : > { %1024 = vmatpush1.bf16.msra.mxu0 %v2814_v61  ;;  %v453_v61 = vrot.slane %v444_v58, %v452_v59 }
  0xe0   : > { %1025 = vmatprep.subr.bf16.mxu0 %v2819_v62 }
  0xe3   : > { %1026 = vmatpush1.bf16.msra.mxu0 %v2817_v63 }
  0xe4   : > { %1027 = vmatprep.subr.bf16.mxu0 %v2822_v0 }
  0xe7   : > { %1028 = vmatpush1.bf16.msra.mxu0 %v2820_v1 }
  0xe8   : > { %1029 = vmatprep.subr.bf16.mxu0 %v2825_v2 }
  0xeb   : > { %1030 = vmatpush1.bf16.msra.mxu0 %v2823_v3 }
  0xec   : > { %1031 = vmatprep.subr.bf16.mxu0 %v2828_v4 }
  0xef   : > { %1032 = vmatpush1.bf16.msra.mxu0 %v2826_v5 }
  0xf0   : > { %1033 = vmatprep.subr.bf16.mxu0 %v2831_v6 }
  0xf3   : > { %1034 = vmatpush1.bf16.msra.mxu0 %v2829_v7 }
  0xf4   : > { %1035 = vmatprep.subr.bf16.mxu0 %v2834_v8 }
  0xf7   : > { %1036 = vmatpush1.bf16.msra.mxu0 %v2832_v9 }
  0xf8   : > { %1037 = vmatprep.subr.bf16.mxu0 %v2837_v10 }
  0xfb   : > { %1038 = vmatpush1.bf16.msra.mxu0 %v2835_v11 }
  0xfc   : > { %1039 = vmatprep.subr.bf16.mxu0 %v2840_v12  ;;  %v2911_v12 = vld [vmem:[#allocation7] sm:$0xff]  }
  0xff   : > { %1040 = vmatpush1.bf16.msra.mxu0 %v2838_v13  ;;  %v2912_v13 = vld [vmem:[#allocation7 + $0x8] sm:$0xff]  }
 0x100   : > { %1052 = vmatprep.subr.bf16.mxu0 %v2846_v14  ;;  %v2913_v14 = vld [vmem:[#allocation7 + $0x10] sm:$0xff]  }
 0x102   : > { %1042 = vmatmul.mubr.bf16.vlgmr.msra.gmra.mrb[0].mxu0 %v2841_v15  ;;  %v2914_v15 = vld [vmem:[#allocation7 + $0x18] sm:$0xff]  }
 0x103   : > { %1053 = vmatpush1.bf16.msra.mxu0 %v2844_v16  ;;  %1084 = vmatprep.mubr.bf16.mxu0 %v2894_v17  ;;  %v2915_v16 = vld [vmem:[#allocation7 + $0x20] sm:$0xff]   ;;  %v2916_v17 = vld [vmem:[#allocation7 + $0x28] sm:$0xff]  }
 0x104   : > { %1054 = vmatprep.subr.bf16.mxu0 %v2849_v18  ;;  %v2917_v18 = vld [vmem:[#allocation7 + $0x30] sm:$0xff]  }
 0x107   : > { %1055 = vmatpush1.bf16.msra.mxu0 %v2847_v19  ;;  %v2918_v19 = vld [vmem:[#allocation7 + $0x38] sm:$0xff]  }
 0x108   : > { %1056 = vmatprep.subr.bf16.mxu0 %v2852_v20 }
 0x10b   : > { %1057 = vmatpush1.bf16.msra.mxu0 %v2850_v21  ;;  %v1131_v21 = vld [vmem:[%s3503_s5 + $0x1] ss:$0 sm:$0xff] }
 0x10c   : > { %1058 = vmatprep.subr.bf16.mxu0 %v2855_v22 }
 0x10f   : > { %1059 = vmatpush1.bf16.msra.mxu0 %v2853_v23 }
 0x110   : > { %1060 = vmatprep.subr.bf16.mxu0 %v2858_v24 }
 0x113   : > { %1061 = vmatpush1.bf16.msra.mxu0 %v2856_v25 }
 0x114   : > { %1062 = vmatprep.subr.bf16.mxu0 %v2861_v26 }
 0x117   : > { %1063 = vmatpush1.bf16.msra.mxu0 %v2859_v27 }
 0x118   : > { %1064 = vmatprep.subr.bf16.mxu0 %v2864_v28 }
 0x11b   : > { %1065 = vmatpush1.bf16.msra.mxu0 %v2862_v29 }
 0x11c   : > { %1066 = vmatprep.subr.bf16.mxu0 %v2867_v30 }
 0x11f   : > { %1067 = vmatpush1.bf16.msra.mxu0 %v2865_v31  ;;  %v2919_v31 = vld [vmem:[#allocation7 + $0x1c0] sm:$0xff]  }
 0x120   : > { %1068 = vmatprep.subr.bf16.mxu0 %v2870_v32 }
 0x123   : > { %1069 = vmatpush1.bf16.msra.mxu0 %v2868_v33  ;;  %v2920_v33 = vld [vmem:[%s333_s30] sm:$0xff]   ;;  %s2236_s30 = sshll.u32 %s3523_s28, 3 }
 0x124   : > { %1070 = vmatprep.subr.bf16.mxu0 %v2873_v34  ;;  %v2921_v34 = vld [vmem:[#allocation7 + $0x40] sm:$0xff]   ;;  %s339_s11 = scalar_lea.vmem %s3504_s6, %s2236_s30 }
 0x127   : > { %1071 = vmatpush1.bf16.msra.mxu0 %v2871_v35  ;;  %v2922_v35 = vld [vmem:[#allocation7 + $0x48] sm:$0xff]  }
 0x128   : > { %1072 = vmatprep.subr.bf16.mxu0 %v2876_v36  ;;  %v2923_v36 = vld [vmem:[#allocation7 + $0x50] sm:$0xff]  }
 0x12b   : > { %1073 = vmatpush1.bf16.msra.mxu0 %v2874_v37  ;;  %v2924_v37 = vld [vmem:[#allocation7 + $0x58] sm:$0xff]  }
 0x12c   : > { %1074 = vmatprep.subr.bf16.mxu0 %v2879_v38  ;;  %v2925_v38 = vld [vmem:[#allocation7 + $0x60] sm:$0xff]  }
 0x12f   : > { %1075 = vmatpush1.bf16.msra.mxu0 %v2877_v39  ;;  %v2926_v39 = vld [vmem:[#allocation7 + $0x68] sm:$0xff]  }
 0x130   : > { %1076 = vmatprep.subr.bf16.mxu0 %v2882_v40  ;;  %v2927_v40 = vld [vmem:[#allocation7 + $0x70] sm:$0xff]  }
 0x133   : > { %1077 = vmatpush1.bf16.msra.mxu0 %v2880_v41  ;;  %v2928_v41 = vld [vmem:[#allocation7 + $0x78] sm:$0xff]  }
 0x134   : > { %1078 = vmatprep.subr.bf16.mxu0 %v2885_v42  ;;  %v1289_v42 = vld [vmem:[%s3503_s5 + $0x2] ss:$0 sm:$0xff] }
 0x137   : > { %1079 = vmatpush1.bf16.msra.mxu0 %v2883_v43 }
 0x138   : > { %1080 = vmatprep.subr.bf16.mxu0 %v2888_v44 }
 0x13b   : > { %1081 = vmatpush1.bf16.msra.mxu0 %v2886_v45 }
 0x13c   : > { %1082 = vmatprep.subr.bf16.mxu0 %v2891_v46 }
 0x13f   : > { %1083 = vmatpush1.bf16.msra.mxu0 %v2889_v47 }
 0x140   : > { %2609 = vmatprep.subr.bf16.mxu0 %v3137_v54 }
 0x142   : > { %1085 = vmatmul.mubr.bf16.vlgmr.msra.gmra.mrb[0].mxu0 %v2892_v48 }
 0x143   : > { %2625 = vmatprep.mubr.msk.bf16.mxu0 %vm3138_vm0, %v3137_v54 }
 0x215   : > { %v1086_v62 = vpop.f32.mrb[0].mxu0 }
 0x216   : > { %v2649_v63 = vadd.f32 %v1086_v62, %v449_v60  ;;  %v1088_v0 = vpop.f32.mrb[1].mxu0  ;;  %v2929_v62 = vld [vmem:[#allocation7 + $0x80] sm:$0xff]  }
 0x217   : > { %v2650_v1 = vadd.f32 %v1088_v0, %v453_v61  ;;  %v1090_v2 = vpop.f32.mrb[2].mxu0  ;;  %v2930_v0 = vld [vmem:[#allocation7 + $0x88] sm:$0xff]  }
 0x218   : > { %v2651_v3 = vadd.f32 %v1090_v2, %v449_v60  ;;  %v1092_v4 = vpop.f32.mrb[3].mxu0  ;;  %v1095_v6 = vmax.f32 %v2649_v63, 0.0  ;;  %v2932_v2 = vld [vmem:[#allocation7 + $0x98] sm:$0xff]  }
 0x219   : > { %v2652_v5 = vadd.f32 %v1092_v4, %v453_v61  ;;  %v1096_v8 = vmax.f32 %v2650_v1, 0.0  ;;  %v2931_v1 = vld [vmem:[#allocation7 + $0x90] sm:$0xff]   ;;  %v2934_v4 = vld [vmem:[#allocation7 + $0xa8] sm:$0xff]  }
 0x21a   : > { %v1097_v7 = vmax.f32 %v2651_v3, 0.0  ;;  %v2933_v3 = vld [vmem:[#allocation7 + $0xa0] sm:$0xff]  }
 0x21b   : > { %v1098_v9 = vmax.f32 %v2652_v5, 0.0  ;;  %v2935_v5 = vld [vmem:[#allocation7 + $0xb0] sm:$0xff]  }
 0x21c   : > { %v1132_v10 = vpack.c.bf16 %v1097_v7, %v1095_v6  ;;  %v2936_v6 = vld [vmem:[#allocation7 + $0xb8] sm:$0xff]   ;;  %v1461_v7 = vld [vmem:[%s3503_s5 + $0x4] ss:$0 sm:$0xff] }
 0x21d   : > { %v1133_v11 = vpack.c.bf16 %v1098_v9, %v1096_v8 }
 0x21f   : > { %1262 = vmatprep.mubr.bf16.mxu1 %v1133_v11 }
 0x220   : > { %1263 = vmatmul.mubr.bf16.vlgmr.msra.gmra.mrb[0].mxu1 %v1132_v10 }
 0x221   : > { %2504 = vmatpush3.bf16.msra.mxu1 %v2911_v12  ;;  %2519 = vmatprep.mubr.msk.bf16.mxu1 %vm3138_vm0, %v3137_v54 }
 0x222   : > { %2505 = vmatprep.subr.bf16.mxu1 %v3137_v54 }
 0x225   : > { %2506 = vmatpush3.bf16.msra.mxu1 %v2912_v13 }
 0x226   : > { %2507 = vmatprep.subr.bf16.mxu1 %v3137_v54 }
 0x229   : > { %2508 = vmatpush3.bf16.msra.mxu1 %v2913_v14 }
 0x22a   : > { %2509 = vmatprep.subr.bf16.mxu1 %v3137_v54 }
 0x22d   : > { %2510 = vmatpush3.bf16.msra.mxu1 %v2914_v15 }
 0x22e   : > { %2511 = vmatprep.subr.bf16.mxu1 %v3137_v54 }
 0x231   : > { %2512 = vmatpush3.bf16.msra.mxu1 %v2915_v16  ;;  %v2937_v16 = vld [vmem:[#allocation7 + $0x100] sm:$0xff]  }
 0x232   : > { %2513 = vmatprep.subr.bf16.mxu1 %v3137_v54 }
 0x235   : > { %2514 = vmatpush3.bf16.msra.mxu1 %v2916_v17 }
 0x236   : > { %2515 = vmatprep.subr.bf16.mxu1 %v3137_v54 }
 0x239   : > { %2516 = vmatpush3.bf16.msra.mxu1 %v2917_v18  ;;  %v2938_v18 = vld [vmem:[#allocation7 + $0x108] sm:$0xff]  }
 0x23a   : > { %2517 = vmatprep.subr.bf16.mxu1 %v3137_v54 }
 0x23d   : > { %2518 = vmatpush3.bf16.msra.mxu1 %v2918_v19  ;;  %v2939_v19 = vld [vmem:[#allocation7 + $0x110] sm:$0xff]  }
 0x23e   : > { %2523 = vmatprep.subr.bf16.mxu1 %v3137_v54 }
 0x2f3   : > { %v2432_v20 = vpop.f32.mrb[0].mxu1 }
 0x2f4   : > { %v2433_v22 = vpop.f32.mrb[1].mxu1 }
 0x2f5   : > { %v2434_v23 = vadd.f32 %v2433_v22, %v2432_v20  ;;  %v2435_v24 = vpop.f32.mrb[2].mxu1  ;;  %v2940_v20 = vld [vmem:[#allocation7 + $0x118] sm:$0xff]   ;;  %v2942_v22 = vld [vmem:[#allocation7 + $0x128] sm:$0xff]  }
 0x2f6   : > { %v2436_v25 = vpop.f32.mrb[3].mxu1 }
 0x2f7   : > { %v1265_v26 = vadd.f32 %v2434_v23, %v1131_v21  ;;  %v2437_v27 = vadd.f32 %v2436_v25, %v2435_v24  ;;  %v2943_v23 = vld [vmem:[#allocation7 + $0x130] sm:$0xff]   ;;  %v2944_v24 = vld [vmem:[#allocation7 + $0x138] sm:$0xff]   ;;  %v1570_v25 = vld [vmem:[%s3503_s5 + $0x5] ss:$0 sm:$0xff] }
 0x2f9   : > { %v1268_v28 = vadd.f32 %v2437_v27, %v1131_v21  ;;  %v1271_v29 = vmax.f32 %v1265_v26, 0.0  ;;  %v2941_v21 = vld [vmem:[#allocation7 + $0x120] sm:$0xff]  }
 0x2fb   : > { %v1272_v30 = vmax.f32 %v1268_v28, 0.0 }
 0x2fd   : > { %v1290_v32 = vpack.c.bf16 %v1272_v30, %v1271_v29 }
 0x2ff   : > { %2520 = vmatmul.mubr.bf16.vlgmr.msra.gmra.mrb[4].mxu1 %v1290_v32 }
 0x300   : > { %2524 = vmatpush3.bf16.msra.mxu1 %v2919_v31  ;;  %2525 = vmatprep.mubr.msk.bf16.mxu1 %vm3138_vm0, %v3137_v54 }
 0x301   : > { %2529 = vmatprep.subr.bf16.mxu1 %v3137_v54 }
 0x307   : > { %2526 = vmatmul.mubr.msk.bf16.vlgmr.msra.gmra.mrb[8].mxu1 %vm1398_vm1, %v2920_v33 }
 0x308   : > { %2530 = vmatpush3.bf16.msra.mxu1 %v2921_v34  ;;  %2545 = vmatprep.mubr.msk.bf16.mxu1 %vm3138_vm0, %v3137_v54  ;;  %v2945_v34 = vld [vmem:[#allocation7 + $0xc0] sm:$0xff]  }
 0x309   : > { %2531 = vmatprep.subr.bf16.mxu1 %v3137_v54 }
 0x30c   : > { %2532 = vmatpush3.bf16.msra.mxu1 %v2922_v35 }
 0x30d   : > { %2533 = vmatprep.subr.bf16.mxu1 %v3137_v54 }
 0x310   : > { %2534 = vmatpush3.bf16.msra.mxu1 %v2923_v36  ;;  %v2946_v36 = vld [vmem:[#allocation7 + $0xc8] sm:$0xff]  }
 0x311   : > { %2535 = vmatprep.subr.bf16.mxu1 %v3137_v54 }
 0x314   : > { %2536 = vmatpush3.bf16.msra.mxu1 %v2924_v37  ;;  %v2947_v37 = vld [vmem:[#allocation7 + $0xd0] sm:$0xff]  }
 0x315   : > { %2537 = vmatprep.subr.bf16.mxu1 %v3137_v54 }
 0x318   : > { %2538 = vmatpush3.bf16.msra.mxu1 %v2925_v38  ;;  %v2948_v38 = vld [vmem:[#allocation7 + $0xd8] sm:$0xff]  }
 0x319   : > { %2539 = vmatprep.subr.bf16.mxu1 %v3137_v54 }
 0x31c   : > { %2540 = vmatpush3.bf16.msra.mxu1 %v2926_v39  ;;  %v2949_v39 = vld [vmem:[#allocation7 + $0xe0] sm:$0xff]  }
 0x31d   : > { %2541 = vmatprep.subr.bf16.mxu1 %v3137_v54 }
 0x320   : > { %2542 = vmatpush3.bf16.msra.mxu1 %v2927_v40  ;;  %v2950_v40 = vld [vmem:[#allocation7 + $0xe8] sm:$0xff]  }
 0x321   : > { %2543 = vmatprep.subr.bf16.mxu1 %v3137_v54 }
 0x324   : > { %2544 = vmatpush3.bf16.msra.mxu1 %v2928_v41  ;;  %v2951_v41 = vld [vmem:[#allocation7 + $0xf0] sm:$0xff]  }
 0x325   : > { %2549 = vmatprep.subr.bf16.mxu1 %v3137_v54 }
 0x3d2   : > { %v1373_v43 = vpop.f32.mrb[4].mxu1 }
 0x3d3   : > { %v1374_v44 = vadd.f32 %v1373_v43, %v1289_v42  ;;  %v2521_v45 = vpop.f32.mrb[5].mxu1  ;;  %v2953_v43 = vld [vmem:[#allocation7 + $0x140] sm:$0xff]  }
 0x3d4   : > { %v1376_v46 = vpop.f32.mrb[6].mxu1  ;;  %2610 = vmatpush3.bf16.msra.mxu0 %v2953_v43  ;;  %v2955_v45 = vld [vmem:[#allocation7 + $0x150] sm:$0xff]  }
 0x3d5   : > { %v1377_v47 = vadd.f32 %v1376_v46, %v1289_v42  ;;  %v2522_v48 = vpop.f32.mrb[7].mxu1  ;;  %v1380_v49 = vmax.f32 %v1374_v44, 0.0  ;;  %v2952_v42 = vld [vmem:[#allocation7 + $0xf8] sm:$0xff]   ;;  %v2954_v44 = vld [vmem:[#allocation7 + $0x148] sm:$0xff]   ;;  %2611 = vmatprep.subr.bf16.mxu0 %v3137_v54 }
 0x3d6   : > { %v2956_v46 = vld [vmem:[#allocation7 + $0x158] sm:$0xff]   ;;  %v2958_v48 = vld [vmem:[#allocation7 + $0x168] sm:$0xff]  }
 0x3d7   : > { %v1381_v50 = vmax.f32 %v1377_v47, 0.0  ;;  %v2957_v47 = vld [vmem:[#allocation7 + $0x160] sm:$0xff]  }
 0x3d8   : > { %2612 = vmatpush3.bf16.msra.mxu0 %v2954_v44 }
 0x3d9   : > { %v3411_v52 = vpack.c.bf16 %v1381_v50, %v1380_v49  ;;  %2613 = vmatprep.subr.bf16.mxu0 %v3137_v54  ;;  %v2959_v49 = vld [vmem:[#allocation7 + $0x170] sm:$0xff]   ;;  %v2960_v50 = vld [vmem:[#allocation7 + $0x178] sm:$0xff]  }
 0x3da   : > { %v1436_v53 = vpop.f32.mrb[8].mxu1 }
 0x3db   : > { %v1437_v55 = vadd.f32 %v1436_v53, %v1386_v51  ;;  %v2527_v56 = vpop.f32.mrb[9].mxu1  ;;  %v2963_v53 = vld [vmem:[#allocation7 + $0x190] sm:$0xff]  }
 0x3dc   : > { %v1439_v57 = vpop.f32.mrb[10].mxu1  ;;  %2614 = vmatpush3.bf16.msra.mxu0 %v2955_v45  ;;  %v2965_v56 = vld [vmem:[#allocation7 + $0x1a0] sm:$0xff]  }
 0x3dd   : > { %v1440_v58 = vadd.f32 %v1439_v57, %v1386_v51  ;;  %v2528_v59 = vpop.f32.mrb[11].mxu1  ;;  %v1443_v60 = vmax.f32 %v1437_v55, 0.0  ;;  %2615 = vmatprep.subr.bf16.mxu0 %v3137_v54  ;;  %v2961_v51 = vld [vmem:[#allocation7 + $0x180] sm:$0xff]   ;;  %v2964_v55 = vld [vmem:[#allocation7 + $0x198] sm:$0xff]   ;;  %v2966_v57 = vld [vmem:[#allocation7 + $0x1a8] sm:$0xff]  }
 0x3df   : > { %v1444_v61 = vmax.f32 %v1440_v58, 0.0 }
 0x3e0   : > { %2616 = vmatpush3.bf16.msra.mxu0 %v2956_v46 }
 0x3e1   : > { %v1462_v63 = vpack.c.bf16 %v1444_v61, %v1443_v60  ;;  %2617 = vmatprep.subr.bf16.mxu0 %v3137_v54 }
 0x3e3   : > { %2546 = vmatmul.mubr.bf16.vlgmr.msra.gmra.mrb[12].mxu1 %v1462_v63  ;;  %v1875_v63 = vld [vmem:[%s3503_s5 + $0x6] ss:$0 sm:$0xff] }
 0x3e4   : > { %2550 = vmatpush3.bf16.msra.mxu1 %v2929_v62  ;;  %2565 = vmatprep.mubr.msk.bf16.mxu1 %vm3138_vm0, %v3137_v54 }
 0x3e5   : > { %2551 = vmatprep.subr.bf16.mxu1 %v3137_v54  ;;  %2618 = vmatpush3.bf16.msra.mxu0 %v2957_v47 }
 0x3e6   : > { %2619 = vmatprep.subr.bf16.mxu0 %v3137_v54 }
 0x3e8   : > { %2552 = vmatpush3.bf16.msra.mxu1 %v2930_v0 }
 0x3e9   : > { %2553 = vmatprep.subr.bf16.mxu1 %v3137_v54  ;;  %2620 = vmatpush3.bf16.msra.mxu0 %v2958_v48 }
 0x3ea   : > { %2621 = vmatprep.subr.bf16.mxu0 %v3137_v54 }
 0x3ec   : > { %2554 = vmatpush3.bf16.msra.mxu1 %v2931_v1 }
 0x3ed   : > { %2555 = vmatprep.subr.bf16.mxu1 %v3137_v54  ;;  %2622 = vmatpush3.bf16.msra.mxu0 %v2959_v49 }
 0x3ee   : > { %2623 = vmatprep.subr.bf16.mxu0 %v3137_v54 }
 0x3f0   : > { %2556 = vmatpush3.bf16.msra.mxu1 %v2932_v2 }
 0x3f1   : > { %2557 = vmatprep.subr.bf16.mxu1 %v3137_v54  ;;  %2624 = vmatpush3.bf16.msra.mxu0 %v2960_v50 }
 0x3f4   : > { %2558 = vmatpush3.bf16.msra.mxu1 %v2933_v3 }
 0x3f5   : > { %2559 = vmatprep.subr.bf16.mxu1 %v3137_v54 }
 0x3f8   : > { %2560 = vmatpush3.bf16.msra.mxu1 %v2934_v4 }
 0x3f9   : > { %2561 = vmatprep.subr.bf16.mxu1 %v3137_v54 }
 0x3fc   : > { %2562 = vmatpush3.bf16.msra.mxu1 %v2935_v5 }
 0x3fd   : > { %2563 = vmatprep.subr.bf16.mxu1 %v3137_v54 }
 0x400   : > { %2564 = vmatpush3.bf16.msra.mxu1 %v2936_v6 }
 0x401   : > { %2569 = vmatprep.subr.bf16.mxu1 %v3137_v54 }
 0x4b6   : > { %v1545_v8 = vpop.f32.mrb[12].mxu1 }
 0x4b7   : > { %v1546_v9 = vadd.f32 %v1545_v8, %v1461_v7  ;;  %v2547_v10 = vpop.f32.mrb[13].mxu1 }
 0x4b8   : > { %v1548_v11 = vpop.f32.mrb[14].mxu1  ;;  %v2967_v10 = vld [vmem:[#allocation7 + $0x1b0] sm:$0xff]  }
 0x4b9   : > { %v1549_v12 = vadd.f32 %v1548_v11, %v1461_v7  ;;  %v2548_v13 = vpop.f32.mrb[15].mxu1  ;;  %v1552_v14 = vmax.f32 %v1546_v9, 0.0  ;;  %v2968_v11 = vld [vmem:[#allocation7 + $0x1b8] sm:$0xff]  }
 0x4bb   : > { %v1553_v15 = vmax.f32 %v1549_v12, 0.0  ;;  %v1896_v12 = vld [vmem:[%s3503_s5 + $0x7] ss:$0 sm:$0xff] }
 0x4bd   : > { %v1571_v17 = vpack.c.bf16 %v1553_v15, %v1552_v14 }
 0x4bf   : > { %2566 = vmatmul.mubr.bf16.vlgmr.msra.gmra.mrb[16].mxu1 %v1571_v17 }
 0x4c0   : > { %2570 = vmatpush3.bf16.msra.mxu1 %v2937_v16  ;;  %2585 = vmatprep.mubr.msk.bf16.mxu1 %vm3138_vm0, %v3137_v54 }
 0x4c1   : > { %2571 = vmatprep.subr.bf16.mxu1 %v3137_v54 }
 0x4c4   : > { %2572 = vmatpush3.bf16.msra.mxu1 %v2938_v18 }
 0x4c5   : > { %2573 = vmatprep.subr.bf16.mxu1 %v3137_v54 }
 0x4c8   : > { %2574 = vmatpush3.bf16.msra.mxu1 %v2939_v19 }
 0x4c9   : > { %2575 = vmatprep.subr.bf16.mxu1 %v3137_v54 }
 0x4cc   : > { %2576 = vmatpush3.bf16.msra.mxu1 %v2940_v20 }
 0x4cd   : > { %2577 = vmatprep.subr.bf16.mxu1 %v3137_v54 }
 0x4d0   : > { %2578 = vmatpush3.bf16.msra.mxu1 %v2941_v21 }
 0x4d1   : > { %2579 = vmatprep.subr.bf16.mxu1 %v3137_v54 }
 0x4d4   : > { %2580 = vmatpush3.bf16.msra.mxu1 %v2942_v22 }
 0x4d5   : > { %2581 = vmatprep.subr.bf16.mxu1 %v3137_v54 }
 0x4d8   : > { %2582 = vmatpush3.bf16.msra.mxu1 %v2943_v23 }
 0x4d9   : > { %2583 = vmatprep.subr.bf16.mxu1 %v3137_v54 }
 0x4dc   : > { %2584 = vmatpush3.bf16.msra.mxu1 %v2944_v24 }
 0x4dd   : > { %2589 = vmatprep.subr.bf16.mxu1 %v3137_v54 }
 0x592   : > { %v1654_v26 = vpop.f32.mrb[16].mxu1 }
 0x593   : > { %v1655_v27 = vadd.f32 %v1654_v26, %v1570_v25  ;;  %v2567_v28 = vpop.f32.mrb[17].mxu1  ;;  %v2098_v26 = vld [vmem:[%s3503_s5 + $0x11] ss:$0 sm:$0xff] }
 0x594   : > { %v1657_v29 = vpop.f32.mrb[18].mxu1 }
 0x595   : > { %v1658_v30 = vadd.f32 %v1657_v29, %v1570_v25  ;;  %v2568_v31 = vpop.f32.mrb[19].mxu1  ;;  %v1661_v32 = vmax.f32 %v1655_v27, 0.0 }
 0x597   : > { %v1662_v33 = vmax.f32 %v1658_v30, 0.0 }
 0x599   : > { %v1680_v35 = vpack.c.bf16 %v1662_v33, %v1661_v32  ;;  %v2099_v33 = vld [vmem:[%s3503_s5 + $0x12] ss:$0 sm:$0xff] }
 0x59b   : > { %2586 = vmatmul.mubr.bf16.vlgmr.msra.gmra.mrb[20].mxu1 %v1680_v35 }
 0x59c   : > { %2590 = vmatpush3.bf16.msra.mxu1 %v2945_v34  ;;  %2605 = vmatprep.mubr.msk.bf16.mxu1 %vm3138_vm0, %v3137_v54 }
 0x59d   : > { %2591 = vmatprep.subr.bf16.mxu1 %v3137_v54 }
 0x5a0   : > { %2592 = vmatpush3.bf16.msra.mxu1 %v2946_v36 }
 0x5a1   : > { %2593 = vmatprep.subr.bf16.mxu1 %v3137_v54 }
 0x5a4   : > { %2594 = vmatpush3.bf16.msra.mxu1 %v2947_v37 }
 0x5a5   : > { %2595 = vmatprep.subr.bf16.mxu1 %v3137_v54 }
 0x5a8   : > { %2596 = vmatpush3.bf16.msra.mxu1 %v2948_v38 }
 0x5a9   : > { %2597 = vmatprep.subr.bf16.mxu1 %v3137_v54 }
 0x5ac   : > { %2598 = vmatpush3.bf16.msra.mxu1 %v2949_v39 }
 0x5ad   : > { %2599 = vmatprep.subr.bf16.mxu1 %v3137_v54 }
 0x5b0   : > { %2600 = vmatpush3.bf16.msra.mxu1 %v2950_v40 }
 0x5b1   : > { %2601 = vmatprep.subr.bf16.mxu1 %v3137_v54 }
 0x5b4   : > { %2602 = vmatpush3.bf16.msra.mxu1 %v2951_v41 }
 0x5b5   : > { %2603 = vmatprep.subr.bf16.mxu1 %v3137_v54 }
 0x5b8   : > { %2604 = vmatpush3.bf16.msra.mxu1 %v2952_v42 }
 0x5b9   : > { %2629 = vmatprep.subr.bf16.mxu1 %v3137_v54 }
 0x5bb   : > { %2606 = vmatmul.mubr.bf16.vlgmr.msra.gmra.mrb[24].mxu1 %v3411_v52  ;;  %v2962_v52 = vld [vmem:[#allocation7 + $0x188] sm:$0xff]  }
 0x5bc   : > { %2645 = vmatprep.mubr.msk.bf16.mxu1 %vm3138_vm0, %v3137_v54  ;;  %2630 = vmatpush3.bf16.msra.mxu1 %v2961_v51 }
 0x5bd   : > { %2631 = vmatprep.subr.bf16.mxu1 %v3137_v54 }
 0x5c0   : > { %2632 = vmatpush3.bf16.msra.mxu1 %v2962_v52 }
 0x5c1   : > { %2633 = vmatprep.subr.bf16.mxu1 %v3137_v54 }
 0x5c4   : > { %2634 = vmatpush3.bf16.msra.mxu1 %v2963_v53 }
 0x5c5   : > { %2635 = vmatprep.subr.bf16.mxu1 %v3137_v54 }
 0x5c8   : > { %2636 = vmatpush3.bf16.msra.mxu1 %v2964_v55 }
 0x5c9   : > { %2637 = vmatprep.subr.bf16.mxu1 %v3137_v54 }
 0x5cc   : > { %2638 = vmatpush3.bf16.msra.mxu1 %v2965_v56 }
 0x5cd   : > { %2639 = vmatprep.subr.bf16.mxu1 %v3137_v54 }
 0x5d0   : > { %2640 = vmatpush3.bf16.msra.mxu1 %v2966_v57 }
 0x5d1   : > { %2641 = vmatprep.subr.bf16.mxu1 %v3137_v54 }
 0x5d4   : > { %2642 = vmatpush3.bf16.msra.mxu1 %v2967_v10 }
 0x5d5   : > { %2643 = vmatprep.subr.bf16.mxu1 %v3137_v54  ;;  %v2005_v54 = vld [vmem:[%s3503_s5 + $0x10] ss:$0 sm:$0xff] }
 0x5d8   : > { %2644 = vmatpush3.bf16.msra.mxu1 %v2968_v11 }
 0x66e   : > { %v1779_v58 = vpop.f32.mrb[20].mxu1 }
 0x66f   : > { %v2587_v59 = vpop.f32.mrb[21].mxu1 }
 0x670   : > { %v1782_v60 = vpop.f32.mrb[22].mxu1 }
 0x671   : > { %v2588_v61 = vpop.f32.mrb[23].mxu1 }
 0x68e   : > { %v1868_v62 = vpop.f32.mrb[24].mxu1 }
 0x68f   : > { %v1869_v0 = vadd.f32 %v1868_v62, %v1779_v58  ;;  %v2607_v1 = vpop.f32.mrb[25].mxu1 }
 0x690   : > { %v1871_v2 = vpop.f32.mrb[26].mxu1 }
 0x691   : > { %v1876_v3 = vadd.f32 %v1875_v63, %v1869_v0  ;;  %v1872_v4 = vadd.f32 %v1871_v2, %v1782_v60  ;;  %v2608_v5 = vpop.f32.mrb[27].mxu1 }
 0x693   : > { %v1877_v6 = vadd.f32 %v1875_v63, %v1872_v4  ;;  %v1878_v7 = vmax.f32 %v1876_v3, 0.0 }
 0x695   : > { %v1879_v8 = vmax.f32 %v1877_v6, 0.0 }
 0x697   : > { %v1897_v9 = vpack.c.bf16 %v1879_v8, %v1878_v7 }
 0x699   : > { %2626 = vmatmul.mubr.bf16.vlgmr.msra.gmra.mrb[4].mxu0 %v1897_v9 }
 0x76c   : > { %v1980_v13 = vpop.f32.mrb[4].mxu0 }
 0x76d   : > { %v1981_v14 = vadd.f32 %v1980_v13, %v1896_v12  ;;  %v2627_v15 = vpop.f32.mrb[5].mxu0 }
 0x76e   : > { %v1983_v16 = vpop.f32.mrb[6].mxu0 }
 0x76f   : > { %v1984_v17 = vadd.f32 %v1983_v16, %v1896_v12  ;;  %v2628_v18 = vpop.f32.mrb[7].mxu0  ;;  %v1987_v19 = vmax.f32 %v1981_v14, 0.0 }
 0x771   : > { %v1988_v20 = vmax.f32 %v1984_v17, 0.0 }
 0x773   : > { %v2006_v21 = vpack.c.bf16 %v1988_v20, %v1987_v19 }
 0x775   : > { %2646 = vmatmul.mubr.bf16.vlgmr.msra.gmra.mrb[28].mxu1 %v2006_v21 }
 0x848   : > { %v2089_v22 = vpop.f32.mrb[28].mxu1 }
 0x849   : > { %v2090_v23 = vadd.f32 %v2089_v22, %v2005_v54  ;;  %v2647_v24 = vpop.f32.mrb[29].mxu1 }
 0x84a   : > { %v2092_v25 = vpop.f32.mrb[30].mxu1 }
 0x84b   : > { %v2096_v27 = vmax.f32 %v2090_v23, 0.0  ;;  %v2093_v28 = vadd.f32 %v2092_v25, %v2005_v54  ;;  %v2648_v29 = vpop.f32.mrb[31].mxu1 }
 0x84d   : > { %v2097_v30 = vmax.f32 %v2093_v28, 0.0  ;;  %v2100_v31 = vmul.f32 %v2098_v26, %v2096_v27 }
 0x84f   : > { %2102 = vadd.xlane.f32.xlu0 %v2100_v31  ;;  %v2101_v32 = vmul.f32 %v2098_v26, %v2097_v30 }
 0x853   : > { %2104 = vadd.xlane.f32.xlu0 %v2101_v32 }
 0x8dc   : > { %v2103_v34 = vpop.xlane.xlu0 %2102 }
 0x8dd   : > { %v2106_v35 = vadd.f32 %v2103_v34, %v2099_v33 }
 0x8df   : > { %2109 = vst.msk [vmem:[%s339_s11] sm:$0xff] %vm2108_vm2, %v2106_v35 }
 0x8e0   : > { %v2105_v36 = vpop.xlane.xlu0 %2104 }
 0x8e1   : > { %v2107_v37 = vadd.f32 %v2105_v36, %v2099_v33 }
 0x8e3   : > { %2110 = vst.msk [vmem:[%s339_s11 + $0x8] sm:$0xff] %vm2108_vm2, %v2107_v37 }
 0x8e4 PF: > { %p18_p6 = scmp.ge.s32.totalorder %s3270_s8, 4   ;;  %s3518_s21 = smov %s3117_s22 }
 0x8e5   : > { %s3519_s22 = smov %s3121_s23  ;;  %s3520_s23 = smov %s3298_s7 }
 0x8e6   : > { %s3521_s24 = smov %s3270_s8  ;;  %20 = sbr.rel (!%p18_p6) target bundleno = 5 (0x5), region = 99 }
 0x8ed   :  { %2133 = vsyncpa [#allocation3], 1 }
 0x8ee   :  { %2135 = vsyncpa [#allocation3 + $0x1], 1 }
 0x8ef   :  { %2136 = vsyncpa [#allocation5], 1 }
 0x8f0   :  { %2137 = vsyncpa [#allocation8], 1 }

</bundles_post_ra>
